<compile_context>
chip_gen: v6e
topology: v6e:2x2x1
jax: 0.10.0
libtpu: 0.0.40
codegen_flags: <defaults>
</compile_context>

<pallas_src>
import functools
import math

import jax
import jax.numpy as jnp
import numpy as np
from jax.experimental import pallas as pl
from jax.experimental.pallas import tpu as pltpu


# --------------------------------- the kernel ---------------------------------

def _res_conv_block_kernel(x_ref, w1_ref, b1_ref, g1_ref, be1_ref,
                           w2_ref, b2_ref, g2_ref, be2_ref,
                           wres_ref, bres_ref, gm_ref, gmt_ref, v_ref, vt_ref,
                           out_ref, *, k_taps, pad, h_valid):
    Cout = out_ref.shape[1]
    G = gm_ref.shape[0]
    inv_n = 1.0 / float((Cout // G) * h_valid)

    gm = gm_ref[...]            # (G, Cout)   group membership
    gmt = gmt_ref[...]          # (Cout, G)
    v = v_ref[...]              # (L, Bt)     valid-column selector (0 on pad cols)
    vt = vt_ref[...]            # (Bt, L)
    mxu_dt = w1_ref.dtype       # f32, or bf16 when use_bf16_matmul=True

    def group_norm(y, gamma, beta, eps=1e-5):
        # reduce over lanes first (valid columns only), then tiny per-group matmuls
        s1 = jnp.dot(y, v, preferred_element_type=jnp.float32)        # (Cout, Bt)
        s2 = jnp.dot(y * y, v, preferred_element_type=jnp.float32)    # (Cout, Bt)
        sum_g = jnp.dot(gm, s1, preferred_element_type=jnp.float32)   # (G, Bt)
        sq_g = jnp.dot(gm, s2, preferred_element_type=jnp.float32)    # (G, Bt)
        mean_g = sum_g * inv_n
        # single-pass variance in f32 with clamp (fine for activation-scale data)
        var_g = jnp.maximum(sq_g * inv_n - mean_g * mean_g, 0.0)
        rstd_g = jax.lax.rsqrt(var_g + eps)
        mean_c = jnp.dot(gmt, mean_g, preferred_element_type=jnp.float32)   # (Cout, Bt)
        rstd_c = jnp.dot(gmt, rstd_g, preferred_element_type=jnp.float32)   # (Cout, Bt)
        scale = gamma * rstd_c                      # (Cout, Bt)
        shift = beta - mean_c * scale               # (Cout, Bt)
        # expand per-(group,segment) scale/shift to the slab; pad columns become 0,
        # which is exactly the zero padding the next conv needs.
        if v.shape[1] == 1:                         # single segment: plain broadcast
            scale_full = scale * vt
            shift_full = shift * vt
        else:
            scale_full = jnp.dot(scale, vt, preferred_element_type=jnp.float32)
            shift_full = jnp.dot(shift, vt, preferred_element_type=jnp.float32)
        return y * scale_full + shift_full

    def mish(z):
        # mish(z) = z * tanh(softplus(z)) = z * u / (u + 2),  u = e^z (e^z + 2)
        t = jnp.exp(jnp.minimum(z, 20.0))           # clamp: no inf -> no inf/inf NaN
        u = t * (t + 2.0)
        d = u + 2.0
        r = pl.reciprocal(d, approx=True)
        r = r * (2.0 - d * r)                       # one Newton step -> f32 accuracy
        return jnp.where(z > 20.0, z, z * u * r)

    def shifted(slab, k):
        # s[:, j] == slab[:, j + (k - pad)] for every column feeding a *valid*
        # output position; out-of-range columns are zero.  (pltpu.roll(slab,
        # pad - k, axis=-1) is an XLU-slot alternative; the wrapped columns only
        # ever land on pad / don't-care output positions.)
        s = k - pad
        if s == 0:
            return slab
        c, n = slab.shape
        z = jnp.zeros((c, abs(s)), slab.dtype)
        if s > 0:
            return jnp.concatenate([slab[:, s:], z], axis=-1)
        return jnp.concatenate([z, slab[:, :n + s]], axis=-1)

    # per-segment zero-padded input slab (Cin_p, L)
    x_slab = x_ref[0]

    # ----------- block 1: Conv1d(K) -> GroupNorm -> Mish (single im2col) -----------
    stack1 = jnp.concatenate([shifted(x_slab, k) for k in range(k_taps)], axis=0)
    y1 = jnp.dot(w1_ref[...], stack1.astype(mxu_dt),
                 preferred_element_type=jnp.float32) + b1_ref[...]
    y1 = mish(group_norm(y1, g1_ref[...], be1_ref[...]))
    # masked GN expansion zeroed every per-segment pad column and mish(0) == 0, so
    # y1 already carries the exact zero padding that block 2's conv needs.

    # ------ block 2: Conv1d(K) -> GroupNorm -> Mish (K accumulating matmuls) ------
    cmid = y1.shape[0]
    y2 = b2_ref[...]
    for k in range(k_taps):
        w2_k = w2_ref[:, k * cmid:(k + 1) * cmid]          # (Cout, Cout), tap k
        y2 = y2 + jnp.dot(w2_k, shifted(y1, k).astype(mxu_dt),
                          preferred_element_type=jnp.float32)
    y2 = mish(group_norm(y2, g2_ref[...], be2_ref[...]))

    # -------------------- residual 1x1 conv on the input slab --------------------
    res = jnp.dot(wres_ref[...], x_slab.astype(mxu_dt),
                  preferred_element_type=jnp.float32) + bres_ref[...]
    out_ref[0] = (y2 + res).astype(out_ref.dtype)


# --------------------------------- wrapper ------------------------------------

def _pow2_floor(n):
    return 1 << (max(int(n), 1).bit_length() - 1)


def _choose_tiling(B, H, pad, l_target):
    """Pick (Bt, nB, Hp) so L = Bt*Hp is a multiple of 128, near l_target lanes."""
    hp_min = H + 2 * pad
    bt = _pow2_floor(min(B, max(1, l_target // hp_min)))
    if B >= 2 and -(-B // bt) < 2:        # keep >= 2 batch tiles (v7x dual TC)
        bt = _pow2_floor(max(1, B // 2))
    nb = -(-B // bt)
    g = 128 // math.gcd(128, bt)          # smallest granule with Bt*Hp % 128 == 0
    hp = -(-hp_min // g) * g
    return bt, nb, hp


def _vmem_limit_bytes():
    kind = ""
    try:
        kind = jax.devices()[0].device_kind.lower()
    except Exception:
        pass
    # v2-v6 TensorCores have 128 MiB VMEM -> allow bigger slabs; v7x (64 MiB)
    # and unknown parts stay conservative.
    roomy = any(t in kind for t in ("v2", "v3", "v4", "v5", "v6"))
    return (80 if roomy else 40) * 1024 * 1024


@functools.partial(jax.jit, static_argnames=("n_groups", "l_target",
                                             "use_bf16_matmul",
                                             "single_buffer_weights"))
def residual_conv_block(x, params, *, n_groups=8, l_target=512,
                        use_bf16_matmul=False, single_buffer_weights=True):
    """x: (B, Cin, H) float32, layout NCH.  Returns (B, Cout, H) float32."""
    w1, b1, g1, be1, w2, b2, g2, be2, wres, bres = params
    B, Cin, H = x.shape
    Cout, _, K = w1.shape
    PAD = K // 2
    G = n_groups
    assert Cout % G == 0, "out_channels must be divisible by n_groups"
    assert Cout % 8 == 0, "out_channels must be a multiple of 8 (sublane tile)"
    f32 = jnp.float32
    wdt = jnp.bfloat16 if use_bf16_matmul else f32

    Cin_p = ((Cin + 7) // 8) * 8                       # sublane-align input channels
    Bt, nB, Hp = _choose_tiling(B, H, PAD, l_target)
    L = Bt * Hp                                        # lanes per slab, L % 128 == 0
    B_pad = nB * Bt

    # ---- pack input: (B, Cin, H) -> (nB, Cin_p, L), per-segment zero padded ----
    xpad = jnp.zeros((B_pad, Cin_p, Hp), f32)
    xpad = xpad.at[:B, :Cin, PAD:PAD + H].set(x.astype(f32))
    x_pack = (xpad.reshape(nB, Bt, Cin_p, Hp)
                  .transpose(0, 2, 1, 3)
                  .reshape(nB, Cin_p, L))

    # ---- conv weights flattened to (Cout, K*Cin), tap-major / channel-minor ----
    w1p = jnp.zeros((Cout, Cin_p, K), f32).at[:, :Cin, :].set(w1.astype(f32))
    w1_flat = jnp.transpose(w1p, (0, 2, 1)).reshape(Cout, K * Cin_p).astype(wdt)
    w2_flat = jnp.transpose(w2.astype(f32), (0, 2, 1)).reshape(Cout, K * Cout).astype(wdt)
    wres_p = jnp.zeros((Cout, Cin_p), f32).at[:, :Cin].set(wres.astype(f32)).astype(wdt)

    # ---- constant helper matrices (group membership, valid-column selector) ----
    gm = np.repeat(np.eye(G, dtype=np.float32), Cout // G, axis=1)        # (G, Cout)
    gmt = np.ascontiguousarray(gm.T)                                      # (Cout, G)
    j = np.arange(L)
    seg, pos = j // Hp, j % Hp
    valid = (pos >= PAD) & (pos < PAD + H)
    V = (valid[:, None] & (seg[:, None] == np.arange(Bt)[None, :])).astype(np.float32)
    Vt = np.ascontiguousarray(V.T)

    col = lambda a: jnp.asarray(a, f32).reshape(-1, 1)

    def const_spec(shape):
        idx = lambda i: (0,) * len(shape)
        if single_buffer_weights:
            # grid-invariant operand: one VMEM buffer is enough (halves weight VMEM)
            return pl.BlockSpec(shape, idx, pipeline_mode=pl.Buffered(1))
        return pl.BlockSpec(shape, idx)

    # NOTE: for large Cout (>= ~256-512, especially on v7x's 64 MiB VMEM) w2_flat
    # should get an output-channel grid axis instead of being fully VMEM-resident.
    kernel = functools.partial(_res_conv_block_kernel, k_taps=K, pad=PAD, h_valid=H)
    out_packed = pl.pallas_call(
        kernel,
        out_shape=jax.ShapeDtypeStruct((nB, Cout, L), f32),
        grid_spec=pltpu.PrefetchScalarGridSpec(
            num_scalar_prefetch=0,
            grid=(nB,),
            in_specs=[
                pl.BlockSpec((1, Cin_p, L), lambda i: (i, 0, 0)),   # packed input slab
                const_spec((Cout, K * Cin_p)),                      # w1 (im2col-flat)
                const_spec((Cout, 1)), const_spec((Cout, 1)), const_spec((Cout, 1)),
                const_spec((Cout, K * Cout)),                       # w2 (tap-major)
                const_spec((Cout, 1)), const_spec((Cout, 1)), const_spec((Cout, 1)),
                const_spec((Cout, Cin_p)), const_spec((Cout, 1)),   # residual 1x1 conv
                const_spec((G, Cout)), const_spec((Cout, G)),       # group membership
                const_spec((L, Bt)), const_spec((Bt, L)),           # valid-col selectors
            ],
            out_specs=pl.BlockSpec((1, Cout, L), lambda i: (i, 0, 0)),
        ),
        compiler_params=pltpu.CompilerParams(
            dimension_semantics=("parallel",),        # batch tiles are independent
            vmem_limit_bytes=_vmem_limit_bytes(),
        ),
    )(x_pack, w1_flat, col(b1), col(g1), col(be1),
      w2_flat, col(b2), col(g2), col(be2),
      wres_p, col(bres), jnp.asarray(gm), jnp.asarray(gmt),
      jnp.asarray(V), jnp.asarray(Vt))

    # unpack: (nB, Cout, L) -> (B, Cout, H)
    out = (out_packed.reshape(nB, Cout, Bt, Hp)
                     .transpose(0, 2, 1, 3)
                     .reshape(B_pad, Cout, Hp))
    return out[:B, :, PAD:PAD + H]


# ------------------------------ pure-JAX reference -----------------------------

def ref_forward(x, params, n_groups=8):
    w1, b1, g1, be1, w2, b2, g2, be2, wres, bres = params

    def conv1d(x, w, b):
        K = w.shape[2]
        pad = K // 2
        H = x.shape[2]
        xp = jnp.pad(x, ((0, 0), (0, 0), (pad, pad)))
        out = sum(jnp.einsum('oi,bih->boh', w[:, :, k], xp[:, :, k:k + H])
                  for k in range(K))
        return out + b[None, :, None]

    def gn(x, gamma, beta, eps=1e-5):
        B, C, H = x.shape
        xg = x.reshape(B, n_groups, -1)
        m = xg.mean(-1, keepdims=True)
        v = ((xg - m) ** 2).mean(-1, keepdims=True)
        xn = ((xg - m) / jnp.sqrt(v + eps)).reshape(B, C, H)
        return xn * gamma[None, :, None] + beta[None, :, None]

    mish = lambda z: z * jnp.tanh(jnp.log1p(jnp.exp(z)))

    out = mish(gn(conv1d(x, w1, b1), g1, be1))
    out = mish(gn(conv1d(out, w2, b2), g2, be2))
    res = jnp.einsum('oi,bih->boh', wres, x) + bres[None, :, None]
    return out + res


# ----------------------------------- main --------------------------------------

if __name__ == "__main__":
    B, Cin, Cout, H, K, G = 2, 4, 16, 16, 5, 8

    key = jax.random.PRNGKey(0)
    ks = jax.random.split(key, 11)
    params = (
        0.1 * jax.random.normal(ks[0], (Cout, Cin, K), jnp.float32),   # w1
        0.1 * jax.random.normal(ks[1], (Cout,), jnp.float32),          # b1
        1.0 + 0.1 * jax.random.normal(ks[2], (Cout,), jnp.float32),    # gamma1
        0.1 * jax.random.normal(ks[3], (Cout,), jnp.float32),          # beta1
        0.1 * jax.random.normal(ks[4], (Cout, Cout, K), jnp.float32),  # w2
        0.1 * jax.random.normal(ks[5], (Cout,), jnp.float32),          # b2
        1.0 + 0.1 * jax.random.normal(ks[6], (Cout,), jnp.float32),    # gamma2
        0.1 * jax.random.normal(ks[7], (Cout,), jnp.float32),          # beta2
        0.1 * jax.random.normal(ks[8], (Cout, Cin), jnp.float32),      # wres (1x1 conv)
        0.1 * jax.random.normal(ks[9], (Cout,), jnp.float32),          # bres
    )
    x = jax.random.normal(ks[10], (B, Cin, H), jnp.float32)

    fwd = functools.partial(residual_conv_block, n_groups=G)
    try:
        out = jax.block_until_ready(fwd(x, params))
    except Exception:
        # Fallback if this jax build lacks BlockSpec pipeline_mode / pl.Buffered:
        out = jax.block_until_ready(fwd(x, params, single_buffer_weights=False))

    ref = jax.block_until_ready(ref_forward(x, params, n_groups=G))
    np.testing.assert_allclose(np.asarray(out), np.asarray(ref),
                               rtol=1e-4, atol=1e-4)
    print("KERNEL_OK")
</pallas_src>

<mosaic_0001>
module attributes {stable_mosaic.version = 11 : i64} {
  func.func @_res_conv_block_kernel(%arg0: i32, %arg1: memref<1x8x128xf32, #tpu.memory_space<vmem>>, %arg2: memref<16x40xf32, #tpu.memory_space<vmem>>, %arg3: memref<16x1xf32, #tpu.memory_space<vmem>>, %arg4: memref<16x1xf32, #tpu.memory_space<vmem>>, %arg5: memref<16x1xf32, #tpu.memory_space<vmem>>, %arg6: memref<16x80xf32, #tpu.memory_space<vmem>>, %arg7: memref<16x1xf32, #tpu.memory_space<vmem>>, %arg8: memref<16x1xf32, #tpu.memory_space<vmem>>, %arg9: memref<16x1xf32, #tpu.memory_space<vmem>>, %arg10: memref<16x8xf32, #tpu.memory_space<vmem>>, %arg11: memref<16x1xf32, #tpu.memory_space<vmem>>, %arg12: memref<8x16xf32, #tpu.memory_space<vmem>>, %arg13: memref<16x8xf32, #tpu.memory_space<vmem>>, %arg14: memref<128x1xf32, #tpu.memory_space<vmem>>, %arg15: memref<1x128xf32, #tpu.memory_space<vmem>>, %arg16: memref<1x16x128xf32, #tpu.memory_space<vmem>>) attributes {dimension_semantics = [#tpu.dimension_semantics<parallel>], iteration_bounds = array<i64: 2>, scalar_prefetch = 0 : i64, scratch_operands = 0 : i64, tpu.core_type = #tpu.core_type<tc>, window_params = [{transform_indices = @transform_0, window_bounds = array<i64: 1, 8, 128>}, {pipeline_mode = #tpu.pipeline_mode<synchronous>, transform_indices = @transform_1, window_bounds = array<i64: 16, 40>}, {pipeline_mode = #tpu.pipeline_mode<synchronous>, transform_indices = @transform_2, window_bounds = array<i64: 16, 1>}, {pipeline_mode = #tpu.pipeline_mode<synchronous>, transform_indices = @transform_3, window_bounds = array<i64: 16, 1>}, {pipeline_mode = #tpu.pipeline_mode<synchronous>, transform_indices = @transform_4, window_bounds = array<i64: 16, 1>}, {pipeline_mode = #tpu.pipeline_mode<synchronous>, transform_indices = @transform_5, window_bounds = array<i64: 16, 80>}, {pipeline_mode = #tpu.pipeline_mode<synchronous>, transform_indices = @transform_6, window_bounds = array<i64: 16, 1>}, {pipeline_mode = #tpu.pipeline_mode<synchronous>, transform_indices = @transform_7, window_bounds = array<i64: 16, 1>}, {pipeline_mode = #tpu.pipeline_mode<synchronous>, transform_indices = @transform_8, window_bounds = array<i64: 16, 1>}, {pipeline_mode = #tpu.pipeline_mode<synchronous>, transform_indices = @transform_9, window_bounds = array<i64: 16, 8>}, {pipeline_mode = #tpu.pipeline_mode<synchronous>, transform_indices = @transform_10, window_bounds = array<i64: 16, 1>}, {pipeline_mode = #tpu.pipeline_mode<synchronous>, transform_indices = @transform_11, window_bounds = array<i64: 8, 16>}, {pipeline_mode = #tpu.pipeline_mode<synchronous>, transform_indices = @transform_12, window_bounds = array<i64: 16, 8>}, {pipeline_mode = #tpu.pipeline_mode<synchronous>, transform_indices = @transform_13, window_bounds = array<i64: 128, 1>}, {pipeline_mode = #tpu.pipeline_mode<synchronous>, transform_indices = @transform_14, window_bounds = array<i64: 1, 128>}, {transform_indices = @transform_15, window_bounds = array<i64: 1, 16, 128>}]} {
    %c0 = arith.constant 0 : index
    %c0_0 = arith.constant 0 : index
    %0 = vector.load %arg12[%c0, %c0_0] : memref<8x16xf32, #tpu.memory_space<vmem>>, vector<8x16xf32>
    %c0_1 = arith.constant 0 : index
    %c0_2 = arith.constant 0 : index
    %1 = vector.load %arg13[%c0_1, %c0_2] : memref<16x8xf32, #tpu.memory_space<vmem>>, vector<16x8xf32>
    %c0_3 = arith.constant 0 : index
    %c0_4 = arith.constant 0 : index
    %2 = vector.load %arg14[%c0_3, %c0_4] : memref<128x1xf32, #tpu.memory_space<vmem>>, vector<128x1xf32>
    %c0_5 = arith.constant 0 : index
    %c0_6 = arith.constant 0 : index
    %3 = vector.load %arg15[%c0_5, %c0_6] : memref<1x128xf32, #tpu.memory_space<vmem>>, vector<1x128xf32>
    %c0_7 = arith.constant 0 : index
    %c0_8 = arith.constant 0 : index
    %c0_9 = arith.constant 0 : index
    %4 = vector.load %arg1[%c0_7, %c0_8, %c0_9] : memref<1x8x128xf32, #tpu.memory_space<vmem>>, vector<1x8x128xf32>
    %5 = vector.shape_cast %4 : vector<1x8x128xf32> to vector<8x128xf32>
    %cst = arith.constant 0.000000e+00 : f32
    %6 = vector.broadcast %cst : f32 to vector<8x2xf32>
    %7 = vector.extract_strided_slice %5 {offsets = [0, 0], sizes = [8, 126], strides = [1, 1]} : vector<8x128xf32> to vector<8x126xf32>
    %8 = tpu.concatenate %6, %7 in 1 : vector<8x2xf32>, vector<8x126xf32> -> vector<8x128xf32>
    %cst_10 = arith.constant 0.000000e+00 : f32
    %9 = vector.broadcast %cst_10 : f32 to vector<8x1xf32>
    %10 = vector.extract_strided_slice %5 {offsets = [0, 0], sizes = [8, 127], strides = [1, 1]} : vector<8x128xf32> to vector<8x127xf32>
    %11 = tpu.concatenate %9, %10 in 1 : vector<8x1xf32>, vector<8x127xf32> -> vector<8x128xf32>
    %cst_11 = arith.constant 0.000000e+00 : f32
    %12 = vector.broadcast %cst_11 : f32 to vector<8x1xf32>
    %13 = vector.extract_strided_slice %5 {offsets = [0, 1], sizes = [8, 127], strides = [1, 1]} : vector<8x128xf32> to vector<8x127xf32>
    %14 = tpu.concatenate %13, %12 in 1 : vector<8x127xf32>, vector<8x1xf32> -> vector<8x128xf32>
    %cst_12 = arith.constant 0.000000e+00 : f32
    %15 = vector.broadcast %cst_12 : f32 to vector<8x2xf32>
    %16 = vector.extract_strided_slice %5 {offsets = [0, 2], sizes = [8, 126], strides = [1, 1]} : vector<8x128xf32> to vector<8x126xf32>
    %17 = tpu.concatenate %16, %15 in 1 : vector<8x126xf32>, vector<8x2xf32> -> vector<8x128xf32>
    %18 = tpu.concatenate %8, %11, %5, %14, %17 in 0 : vector<8x128xf32>, vector<8x128xf32>, vector<8x128xf32>, vector<8x128xf32>, vector<8x128xf32> -> vector<40x128xf32>
    %c0_13 = arith.constant 0 : index
    %c0_14 = arith.constant 0 : index
    %19 = vector.load %arg2[%c0_13, %c0_14] : memref<16x40xf32, #tpu.memory_space<vmem>>, vector<16x40xf32>
    %cst_15 = arith.constant dense<0.000000e+00> : vector<16x128xf32>
    %20 = tpu.matmul %19, %18, %cst_15 {dimension_numbers = #tpu.dot_dimension_numbers<[1], [0], [0], [1], [0, 0, 1, 1], [], []>} : vector<16x40xf32>, vector<40x128xf32>, vector<16x128xf32> -> vector<16x128xf32>
    %c0_16 = arith.constant 0 : index
    %c0_17 = arith.constant 0 : index
    %21 = vector.load %arg3[%c0_16, %c0_17] : memref<16x1xf32, #tpu.memory_space<vmem>>, vector<16x1xf32>
    %22 = vector.broadcast %21 : vector<16x1xf32> to vector<16x128xf32>
    %23 = arith.addf %20, %22 : vector<16x128xf32>
    %c0_18 = arith.constant 0 : index
    %c0_19 = arith.constant 0 : index
    %24 = vector.load %arg4[%c0_18, %c0_19] : memref<16x1xf32, #tpu.memory_space<vmem>>, vector<16x1xf32>
    %c0_20 = arith.constant 0 : index
    %c0_21 = arith.constant 0 : index
    %25 = vector.load %arg5[%c0_20, %c0_21] : memref<16x1xf32, #tpu.memory_space<vmem>>, vector<16x1xf32>
    %cst_22 = arith.constant dense<0.000000e+00> : vector<16x1xf32>
    %26 = tpu.matmul %23, %2, %cst_22 {dimension_numbers = #tpu.dot_dimension_numbers<[1], [0], [0], [1], [0, 0, 1, 1], [], []>} : vector<16x128xf32>, vector<128x1xf32>, vector<16x1xf32> -> vector<16x1xf32>
    %27 = arith.mulf %23, %23 : vector<16x128xf32>
    %cst_23 = arith.constant dense<0.000000e+00> : vector<16x1xf32>
    %28 = tpu.matmul %27, %2, %cst_23 {dimension_numbers = #tpu.dot_dimension_numbers<[1], [0], [0], [1], [0, 0, 1, 1], [], []>} : vector<16x128xf32>, vector<128x1xf32>, vector<16x1xf32> -> vector<16x1xf32>
    %cst_24 = arith.constant dense<0.000000e+00> : vector<8x1xf32>
    %29 = tpu.matmul %0, %26, %cst_24 {dimension_numbers = #tpu.dot_dimension_numbers<[1], [0], [0], [1], [0, 0, 1, 1], [], []>} : vector<8x16xf32>, vector<16x1xf32>, vector<8x1xf32> -> vector<8x1xf32>
    %cst_25 = arith.constant dense<0.000000e+00> : vector<8x1xf32>
    %30 = tpu.matmul %0, %28, %cst_25 {dimension_numbers = #tpu.dot_dimension_numbers<[1], [0], [0], [1], [0, 0, 1, 1], [], []>} : vector<8x16xf32>, vector<16x1xf32>, vector<8x1xf32> -> vector<8x1xf32>
    %cst_26 = arith.constant 3.125000e-02 : f32
    %31 = vector.broadcast %cst_26 : f32 to vector<8x1xf32>
    %32 = arith.mulf %29, %31 : vector<8x1xf32>
    %cst_27 = arith.constant 3.125000e-02 : f32
    %33 = vector.broadcast %cst_27 : f32 to vector<8x1xf32>
    %34 = arith.mulf %30, %33 : vector<8x1xf32>
    %35 = arith.mulf %32, %32 : vector<8x1xf32>
    %36 = arith.subf %34, %35 : vector<8x1xf32>
    %cst_28 = arith.constant 0.000000e+00 : f32
    %37 = vector.broadcast %cst_28 : f32 to vector<8x1xf32>
    %38 = arith.maximumf %36, %37 : vector<8x1xf32>
    %cst_29 = arith.constant 9.99999974E-6 : f32
    %39 = vector.broadcast %cst_29 : f32 to vector<8x1xf32>
    %40 = arith.addf %38, %39 : vector<8x1xf32>
    %41 = math.rsqrt %40 : vector<8x1xf32>
    %cst_30 = arith.constant dense<0.000000e+00> : vector<16x1xf32>
    %42 = tpu.matmul %1, %32, %cst_30 {dimension_numbers = #tpu.dot_dimension_numbers<[1], [0], [0], [1], [0, 0, 1, 1], [], []>} : vector<16x8xf32>, vector<8x1xf32>, vector<16x1xf32> -> vector<16x1xf32>
    %cst_31 = arith.constant dense<0.000000e+00> : vector<16x1xf32>
    %43 = tpu.matmul %1, %41, %cst_31 {dimension_numbers = #tpu.dot_dimension_numbers<[1], [0], [0], [1], [0, 0, 1, 1], [], []>} : vector<16x8xf32>, vector<8x1xf32>, vector<16x1xf32> -> vector<16x1xf32>
    %44 = arith.mulf %24, %43 : vector<16x1xf32>
    %45 = arith.mulf %42, %44 : vector<16x1xf32>
    %46 = arith.subf %25, %45 : vector<16x1xf32>
    %47 = vector.broadcast %44 : vector<16x1xf32> to vector<16x128xf32>
    %48 = vector.broadcast %3 : vector<1x128xf32> to vector<16x128xf32>
    %49 = arith.mulf %47, %48 : vector<16x128xf32>
    %50 = vector.broadcast %46 : vector<16x1xf32> to vector<16x128xf32>
    %51 = vector.broadcast %3 : vector<1x128xf32> to vector<16x128xf32>
    %52 = arith.mulf %50, %51 : vector<16x128xf32>
    %53 = arith.mulf %23, %49 : vector<16x128xf32>
    %54 = arith.addf %53, %52 : vector<16x128xf32>
    %cst_32 = arith.constant 2.000000e+01 : f32
    %55 = vector.broadcast %cst_32 : f32 to vector<16x128xf32>
    %56 = arith.minimumf %54, %55 : vector<16x128xf32>
    %57 = math.exp %56 : vector<16x128xf32>
    %cst_33 = arith.constant 2.000000e+00 : f32
    %58 = vector.broadcast %cst_33 : f32 to vector<16x128xf32>
    %59 = arith.addf %57, %58 : vector<16x128xf32>
    %60 = arith.mulf %57, %59 : vector<16x128xf32>
    %cst_34 = arith.constant 2.000000e+00 : f32
    %61 = vector.broadcast %cst_34 : f32 to vector<16x128xf32>
    %62 = arith.addf %60, %61 : vector<16x128xf32>
    %63 = tpu.reciprocal %62 {approx = true} : vector<16x128xf32> -> vector<16x128xf32>
    %64 = arith.mulf %62, %63 : vector<16x128xf32>
    %cst_35 = arith.constant 2.000000e+00 : f32
    %65 = vector.broadcast %cst_35 : f32 to vector<16x128xf32>
    %66 = arith.subf %65, %64 : vector<16x128xf32>
    %67 = arith.mulf %63, %66 : vector<16x128xf32>
    %cst_36 = arith.constant 2.000000e+01 : f32
    %68 = vector.broadcast %cst_36 : f32 to vector<16x128xf32>
    %69 = arith.cmpf ogt, %54, %68 : vector<16x128xf32>
    %70 = arith.mulf %54, %60 : vector<16x128xf32>
    %71 = arith.mulf %70, %67 : vector<16x128xf32>
    %72 = arith.select %69, %54, %71 : vector<16x128xi1>, vector<16x128xf32>
    %c0_37 = arith.constant 0 : index
    %c0_38 = arith.constant 0 : index
    %73 = vector.load %arg7[%c0_37, %c0_38] : memref<16x1xf32, #tpu.memory_space<vmem>>, vector<16x1xf32>
    %c0_39 = arith.constant 0 : index
    %c0_40 = arith.constant 0 : index
    %74 = vector.load %arg6[%c0_39, %c0_40] : memref<16x80xf32, #tpu.memory_space<vmem>>, vector<16x16xf32>
    %cst_41 = arith.constant 0.000000e+00 : f32
    %75 = vector.broadcast %cst_41 : f32 to vector<16x2xf32>
    %76 = vector.extract_strided_slice %72 {offsets = [0, 0], sizes = [16, 126], strides = [1, 1]} : vector<16x128xf32> to vector<16x126xf32>
    %77 = tpu.concatenate %75, %76 in 1 : vector<16x2xf32>, vector<16x126xf32> -> vector<16x128xf32>
    %cst_42 = arith.constant dense<0.000000e+00> : vector<16x128xf32>
    %78 = tpu.matmul %74, %77, %cst_42 {dimension_numbers = #tpu.dot_dimension_numbers<[1], [0], [0], [1], [0, 0, 1, 1], [], []>} : vector<16x16xf32>, vector<16x128xf32>, vector<16x128xf32> -> vector<16x128xf32>
    %79 = vector.broadcast %73 : vector<16x1xf32> to vector<16x128xf32>
    %80 = arith.addf %79, %78 : vector<16x128xf32>
    %c0_43 = arith.constant 0 : index
    %c16 = arith.constant 16 : index
    %81 = vector.load %arg6[%c0_43, %c16] : memref<16x80xf32, #tpu.memory_space<vmem>>, vector<16x16xf32>
    %cst_44 = arith.constant 0.000000e+00 : f32
    %82 = vector.broadcast %cst_44 : f32 to vector<16x1xf32>
    %83 = vector.extract_strided_slice %72 {offsets = [0, 0], sizes = [16, 127], strides = [1, 1]} : vector<16x128xf32> to vector<16x127xf32>
    %84 = tpu.concatenate %82, %83 in 1 : vector<16x1xf32>, vector<16x127xf32> -> vector<16x128xf32>
    %cst_45 = arith.constant dense<0.000000e+00> : vector<16x128xf32>
    %85 = tpu.matmul %81, %84, %cst_45 {dimension_numbers = #tpu.dot_dimension_numbers<[1], [0], [0], [1], [0, 0, 1, 1], [], []>} : vector<16x16xf32>, vector<16x128xf32>, vector<16x128xf32> -> vector<16x128xf32>
    %86 = arith.addf %80, %85 : vector<16x128xf32>
    %c0_46 = arith.constant 0 : index
    %c32 = arith.constant 32 : index
    %87 = vector.load %arg6[%c0_46, %c32] : memref<16x80xf32, #tpu.memory_space<vmem>>, vector<16x16xf32>
    %cst_47 = arith.constant dense<0.000000e+00> : vector<16x128xf32>
    %88 = tpu.matmul %87, %72, %cst_47 {dimension_numbers = #tpu.dot_dimension_numbers<[1], [0], [0], [1], [0, 0, 1, 1], [], []>} : vector<16x16xf32>, vector<16x128xf32>, vector<16x128xf32> -> vector<16x128xf32>
    %89 = arith.addf %86, %88 : vector<16x128xf32>
    %c0_48 = arith.constant 0 : index
    %c48 = arith.constant 48 : index
    %90 = vector.load %arg6[%c0_48, %c48] : memref<16x80xf32, #tpu.memory_space<vmem>>, vector<16x16xf32>
    %cst_49 = arith.constant 0.000000e+00 : f32
    %91 = vector.broadcast %cst_49 : f32 to vector<16x1xf32>
    %92 = vector.extract_strided_slice %72 {offsets = [0, 1], sizes = [16, 127], strides = [1, 1]} : vector<16x128xf32> to vector<16x127xf32>
    %93 = tpu.concatenate %92, %91 in 1 : vector<16x127xf32>, vector<16x1xf32> -> vector<16x128xf32>
    %cst_50 = arith.constant dense<0.000000e+00> : vector<16x128xf32>
    %94 = tpu.matmul %90, %93, %cst_50 {dimension_numbers = #tpu.dot_dimension_numbers<[1], [0], [0], [1], [0, 0, 1, 1], [], []>} : vector<16x16xf32>, vector<16x128xf32>, vector<16x128xf32> -> vector<16x128xf32>
    %95 = arith.addf %89, %94 : vector<16x128xf32>
    %c0_51 = arith.constant 0 : index
    %c64 = arith.constant 64 : index
    %96 = vector.load %arg6[%c0_51, %c64] : memref<16x80xf32, #tpu.memory_space<vmem>>, vector<16x16xf32>
    %cst_52 = arith.constant 0.000000e+00 : f32
    %97 = vector.broadcast %cst_52 : f32 to vector<16x2xf32>
    %98 = vector.extract_strided_slice %72 {offsets = [0, 2], sizes = [16, 126], strides = [1, 1]} : vector<16x128xf32> to vector<16x126xf32>
    %99 = tpu.concatenate %98, %97 in 1 : vector<16x126xf32>, vector<16x2xf32> -> vector<16x128xf32>
    %cst_53 = arith.constant dense<0.000000e+00> : vector<16x128xf32>
    %100 = tpu.matmul %96, %99, %cst_53 {dimension_numbers = #tpu.dot_dimension_numbers<[1], [0], [0], [1], [0, 0, 1, 1], [], []>} : vector<16x16xf32>, vector<16x128xf32>, vector<16x128xf32> -> vector<16x128xf32>
    %101 = arith.addf %95, %100 : vector<16x128xf32>
    %c0_54 = arith.constant 0 : index
    %c0_55 = arith.constant 0 : index
    %102 = vector.load %arg8[%c0_54, %c0_55] : memref<16x1xf32, #tpu.memory_space<vmem>>, vector<16x1xf32>
    %c0_56 = arith.constant 0 : index
    %c0_57 = arith.constant 0 : index
    %103 = vector.load %arg9[%c0_56, %c0_57] : memref<16x1xf32, #tpu.memory_space<vmem>>, vector<16x1xf32>
    %cst_58 = arith.constant dense<0.000000e+00> : vector<16x1xf32>
    %104 = tpu.matmul %101, %2, %cst_58 {dimension_numbers = #tpu.dot_dimension_numbers<[1], [0], [0], [1], [0, 0, 1, 1], [], []>} : vector<16x128xf32>, vector<128x1xf32>, vector<16x1xf32> -> vector<16x1xf32>
    %105 = arith.mulf %101, %101 : vector<16x128xf32>
    %cst_59 = arith.constant dense<0.000000e+00> : vector<16x1xf32>
    %106 = tpu.matmul %105, %2, %cst_59 {dimension_numbers = #tpu.dot_dimension_numbers<[1], [0], [0], [1], [0, 0, 1, 1], [], []>} : vector<16x128xf32>, vector<128x1xf32>, vector<16x1xf32> -> vector<16x1xf32>
    %cst_60 = arith.constant dense<0.000000e+00> : vector<8x1xf32>
    %107 = tpu.matmul %0, %104, %cst_60 {dimension_numbers = #tpu.dot_dimension_numbers<[1], [0], [0], [1], [0, 0, 1, 1], [], []>} : vector<8x16xf32>, vector<16x1xf32>, vector<8x1xf32> -> vector<8x1xf32>
    %cst_61 = arith.constant dense<0.000000e+00> : vector<8x1xf32>
    %108 = tpu.matmul %0, %106, %cst_61 {dimension_numbers = #tpu.dot_dimension_numbers<[1], [0], [0], [1], [0, 0, 1, 1], [], []>} : vector<8x16xf32>, vector<16x1xf32>, vector<8x1xf32> -> vector<8x1xf32>
    %cst_62 = arith.constant 3.125000e-02 : f32
    %109 = vector.broadcast %cst_62 : f32 to vector<8x1xf32>
    %110 = arith.mulf %107, %109 : vector<8x1xf32>
    %cst_63 = arith.constant 3.125000e-02 : f32
    %111 = vector.broadcast %cst_63 : f32 to vector<8x1xf32>
    %112 = arith.mulf %108, %111 : vector<8x1xf32>
    %113 = arith.mulf %110, %110 : vector<8x1xf32>
    %114 = arith.subf %112, %113 : vector<8x1xf32>
    %cst_64 = arith.constant 0.000000e+00 : f32
    %115 = vector.broadcast %cst_64 : f32 to vector<8x1xf32>
    %116 = arith.maximumf %114, %115 : vector<8x1xf32>
    %cst_65 = arith.constant 9.99999974E-6 : f32
    %117 = vector.broadcast %cst_65 : f32 to vector<8x1xf32>
    %118 = arith.addf %116, %117 : vector<8x1xf32>
    %119 = math.rsqrt %118 : vector<8x1xf32>
    %cst_66 = arith.constant dense<0.000000e+00> : vector<16x1xf32>
    %120 = tpu.matmul %1, %110, %cst_66 {dimension_numbers = #tpu.dot_dimension_numbers<[1], [0], [0], [1], [0, 0, 1, 1], [], []>} : vector<16x8xf32>, vector<8x1xf32>, vector<16x1xf32> -> vector<16x1xf32>
    %cst_67 = arith.constant dense<0.000000e+00> : vector<16x1xf32>
    %121 = tpu.matmul %1, %119, %cst_67 {dimension_numbers = #tpu.dot_dimension_numbers<[1], [0], [0], [1], [0, 0, 1, 1], [], []>} : vector<16x8xf32>, vector<8x1xf32>, vector<16x1xf32> -> vector<16x1xf32>
    %122 = arith.mulf %102, %121 : vector<16x1xf32>
    %123 = arith.mulf %120, %122 : vector<16x1xf32>
    %124 = arith.subf %103, %123 : vector<16x1xf32>
    %125 = vector.broadcast %122 : vector<16x1xf32> to vector<16x128xf32>
    %126 = vector.broadcast %3 : vector<1x128xf32> to vector<16x128xf32>
    %127 = arith.mulf %125, %126 : vector<16x128xf32>
    %128 = vector.broadcast %124 : vector<16x1xf32> to vector<16x128xf32>
    %129 = vector.broadcast %3 : vector<1x128xf32> to vector<16x128xf32>
    %130 = arith.mulf %128, %129 : vector<16x128xf32>
    %131 = arith.mulf %101, %127 : vector<16x128xf32>
    %132 = arith.addf %131, %130 : vector<16x128xf32>
    %cst_68 = arith.constant 2.000000e+01 : f32
    %133 = vector.broadcast %cst_68 : f32 to vector<16x128xf32>
    %134 = arith.minimumf %132, %133 : vector<16x128xf32>
    %135 = math.exp %134 : vector<16x128xf32>
    %cst_69 = arith.constant 2.000000e+00 : f32
    %136 = vector.broadcast %cst_69 : f32 to vector<16x128xf32>
    %137 = arith.addf %135, %136 : vector<16x128xf32>
    %138 = arith.mulf %135, %137 : vector<16x128xf32>
    %cst_70 = arith.constant 2.000000e+00 : f32
    %139 = vector.broadcast %cst_70 : f32 to vector<16x128xf32>
    %140 = arith.addf %138, %139 : vector<16x128xf32>
    %141 = tpu.reciprocal %140 {approx = true} : vector<16x128xf32> -> vector<16x128xf32>
    %142 = arith.mulf %140, %141 : vector<16x128xf32>
    %cst_71 = arith.constant 2.000000e+00 : f32
    %143 = vector.broadcast %cst_71 : f32 to vector<16x128xf32>
    %144 = arith.subf %143, %142 : vector<16x128xf32>
    %145 = arith.mulf %141, %144 : vector<16x128xf32>
    %cst_72 = arith.constant 2.000000e+01 : f32
    %146 = vector.broadcast %cst_72 : f32 to vector<16x128xf32>
    %147 = arith.cmpf ogt, %132, %146 : vector<16x128xf32>
    %148 = arith.mulf %132, %138 : vector<16x128xf32>
    %149 = arith.mulf %148, %145 : vector<16x128xf32>
    %150 = arith.select %147, %132, %149 : vector<16x128xi1>, vector<16x128xf32>
    %c0_73 = arith.constant 0 : index
    %c0_74 = arith.constant 0 : index
    %151 = vector.load %arg10[%c0_73, %c0_74] : memref<16x8xf32, #tpu.memory_space<vmem>>, vector<16x8xf32>
    %cst_75 = arith.constant dense<0.000000e+00> : vector<16x128xf32>
    %152 = tpu.matmul %151, %5, %cst_75 {dimension_numbers = #tpu.dot_dimension_numbers<[1], [0], [0], [1], [0, 0, 1, 1], [], []>} : vector<16x8xf32>, vector<8x128xf32>, vector<16x128xf32> -> vector<16x128xf32>
    %c0_76 = arith.constant 0 : index
    %c0_77 = arith.constant 0 : index
    %153 = vector.load %arg11[%c0_76, %c0_77] : memref<16x1xf32, #tpu.memory_space<vmem>>, vector<16x1xf32>
    %154 = vector.broadcast %153 : vector<16x1xf32> to vector<16x128xf32>
    %155 = arith.addf %152, %154 : vector<16x128xf32>
    %156 = arith.addf %150, %155 : vector<16x128xf32>
    %c0_78 = arith.constant 0 : index
    %c0_79 = arith.constant 0 : index
    %c0_80 = arith.constant 0 : index
    %157 = vector.load %arg16[%c0_78, %c0_79, %c0_80] : memref<1x16x128xf32, #tpu.memory_space<vmem>>, vector<1x16x128xf32>
    %158 = vector.shape_cast %157 : vector<1x16x128xf32> to vector<16x128xf32>
    %159 = vector.shape_cast %156 : vector<16x128xf32> to vector<1x16x128xf32>
    tpu.vector_store %arg16[%c0_78, %c0_79, %c0_80], %159 {strides = array<i32>} : memref<1x16x128xf32, #tpu.memory_space<vmem>>, vector<1x16x128xf32>,
    return
  }
  func.func @transform_0(%arg0: i32) -> (i32, i32, i32) {
    %c0_i32 = arith.constant 0 : i32
    %c0_i32_0 = arith.constant 0 : i32
    %c0_i32_1 = arith.constant 0 : i32
    return %arg0, %c0_i32, %c0_i32_0 : i32, i32, i32
  }
  func.func @transform_1(%arg0: i32) -> (i32, i32) {
    %c0_i32 = arith.constant 0 : i32
    %c0_i32_0 = arith.constant 0 : i32
    %c0_i32_1 = arith.constant 0 : i32
    return %c0_i32, %c0_i32_0 : i32, i32
  }
  func.func @transform_2(%arg0: i32) -> (i32, i32) {
    %c0_i32 = arith.constant 0 : i32
    %c0_i32_0 = arith.constant 0 : i32
    %c0_i32_1 = arith.constant 0 : i32
    return %c0_i32, %c0_i32_0 : i32, i32
  }
  func.func @transform_3(%arg0: i32) -> (i32, i32) {
    %c0_i32 = arith.constant 0 : i32
    %c0_i32_0 = arith.constant 0 : i32
    %c0_i32_1 = arith.constant 0 : i32
    return %c0_i32, %c0_i32_0 : i32, i32
  }
  func.func @transform_4(%arg0: i32) -> (i32, i32) {
    %c0_i32 = arith.constant 0 : i32
    %c0_i32_0 = arith.constant 0 : i32
    %c0_i32_1 = arith.constant 0 : i32
    return %c0_i32, %c0_i32_0 : i32, i32
  }
  func.func @transform_5(%arg0: i32) -> (i32, i32) {
    %c0_i32 = arith.constant 0 : i32
    %c0_i32_0 = arith.constant 0 : i32
    %c0_i32_1 = arith.constant 0 : i32
    return %c0_i32, %c0_i32_0 : i32, i32
  }
  func.func @transform_6(%arg0: i32) -> (i32, i32) {
    %c0_i32 = arith.constant 0 : i32
    %c0_i32_0 = arith.constant 0 : i32
    %c0_i32_1 = arith.constant 0 : i32
    return %c0_i32, %c0_i32_0 : i32, i32
  }
  func.func @transform_7(%arg0: i32) -> (i32, i32) {
    %c0_i32 = arith.constant 0 : i32
    %c0_i32_0 = arith.constant 0 : i32
    %c0_i32_1 = arith.constant 0 : i32
    return %c0_i32, %c0_i32_0 : i32, i32
  }
  func.func @transform_8(%arg0: i32) -> (i32, i32) {
    %c0_i32 = arith.constant 0 : i32
    %c0_i32_0 = arith.constant 0 : i32
    %c0_i32_1 = arith.constant 0 : i32
    return %c0_i32, %c0_i32_0 : i32, i32
  }
  func.func @transform_9(%arg0: i32) -> (i32, i32) {
    %c0_i32 = arith.constant 0 : i32
    %c0_i32_0 = arith.constant 0 : i32
    %c0_i32_1 = arith.constant 0 : i32
    return %c0_i32, %c0_i32_0 : i32, i32
  }
  func.func @transform_10(%arg0: i32) -> (i32, i32) {
    %c0_i32 = arith.constant 0 : i32
    %c0_i32_0 = arith.constant 0 : i32
    %c0_i32_1 = arith.constant 0 : i32
    return %c0_i32, %c0_i32_0 : i32, i32
  }
  func.func @transform_11(%arg0: i32) -> (i32, i32) {
    %c0_i32 = arith.constant 0 : i32
    %c0_i32_0 = arith.constant 0 : i32
    %c0_i32_1 = arith.constant 0 : i32
    return %c0_i32, %c0_i32_0 : i32, i32
  }
  func.func @transform_12(%arg0: i32) -> (i32, i32) {
    %c0_i32 = arith.constant 0 : i32
    %c0_i32_0 = arith.constant 0 : i32
    %c0_i32_1 = arith.constant 0 : i32
    return %c0_i32, %c0_i32_0 : i32, i32
  }
  func.func @transform_13(%arg0: i32) -> (i32, i32) {
    %c0_i32 = arith.constant 0 : i32
    %c0_i32_0 = arith.constant 0 : i32
    %c0_i32_1 = arith.constant 0 : i32
    return %c0_i32, %c0_i32_0 : i32, i32
  }
  func.func @transform_14(%arg0: i32) -> (i32, i32) {
    %c0_i32 = arith.constant 0 : i32
    %c0_i32_0 = arith.constant 0 : i32
    %c0_i32_1 = arith.constant 0 : i32
    return %c0_i32, %c0_i32_0 : i32, i32
  }
  func.func @transform_15(%arg0: i32) -> (i32, i32, i32) {
    %c0_i32 = arith.constant 0 : i32
    %c0_i32_0 = arith.constant 0 : i32
    %c0_i32_1 = arith.constant 0 : i32
    return %arg0, %c0_i32, %c0_i32_0 : i32, i32, i32
  }
}

module attributes {stable_mosaic.version = 11 : i64} {
  func.func @_res_conv_block_kernel(%arg0: i32, %arg1: memref<1x8x128xf32, #tpu.memory_space<vmem>>, %arg2: memref<16x40xf32, #tpu.memory_space<vmem>>, %arg3: memref<16x1xf32, #tpu.memory_space<vmem>>, %arg4: memref<16x1xf32, #tpu.memory_space<vmem>>, %arg5: memref<16x1xf32, #tpu.memory_space<vmem>>, %arg6: memref<16x80xf32, #tpu.memory_space<vmem>>, %arg7: memref<16x1xf32, #tpu.memory_space<vmem>>, %arg8: memref<16x1xf32, #tpu.memory_space<vmem>>, %arg9: memref<16x1xf32, #tpu.memory_space<vmem>>, %arg10: memref<16x8xf32, #tpu.memory_space<vmem>>, %arg11: memref<16x1xf32, #tpu.memory_space<vmem>>, %arg12: memref<8x16xf32, #tpu.memory_space<vmem>>, %arg13: memref<16x8xf32, #tpu.memory_space<vmem>>, %arg14: memref<128x1xf32, #tpu.memory_space<vmem>>, %arg15: memref<1x128xf32, #tpu.memory_space<vmem>>, %arg16: memref<1x16x128xf32, #tpu.memory_space<vmem>>) attributes {dimension_semantics = [#tpu.dimension_semantics<parallel>], iteration_bounds = array<i64: 2>, scalar_prefetch = 0 : i64, scratch_operands = 0 : i64, tpu.core_type = #tpu.core_type<tc>, window_params = [{transform_indices = @transform_0, window_bounds = array<i64: 1, 8, 128>}, {pipeline_mode = #tpu.pipeline_mode<synchronous>, transform_indices = @transform_1, window_bounds = array<i64: 16, 40>}, {pipeline_mode = #tpu.pipeline_mode<synchronous>, transform_indices = @transform_2, window_bounds = array<i64: 16, 1>}, {pipeline_mode = #tpu.pipeline_mode<synchronous>, transform_indices = @transform_3, window_bounds = array<i64: 16, 1>}, {pipeline_mode = #tpu.pipeline_mode<synchronous>, transform_indices = @transform_4, window_bounds = array<i64: 16, 1>}, {pipeline_mode = #tpu.pipeline_mode<synchronous>, transform_indices = @transform_5, window_bounds = array<i64: 16, 80>}, {pipeline_mode = #tpu.pipeline_mode<synchronous>, transform_indices = @transform_6, window_bounds = array<i64: 16, 1>}, {pipeline_mode = #tpu.pipeline_mode<synchronous>, transform_indices = @transform_7, window_bounds = array<i64: 16, 1>}, {pipeline_mode = #tpu.pipeline_mode<synchronous>, transform_indices = @transform_8, window_bounds = array<i64: 16, 1>}, {pipeline_mode = #tpu.pipeline_mode<synchronous>, transform_indices = @transform_9, window_bounds = array<i64: 16, 8>}, {pipeline_mode = #tpu.pipeline_mode<synchronous>, transform_indices = @transform_10, window_bounds = array<i64: 16, 1>}, {pipeline_mode = #tpu.pipeline_mode<synchronous>, transform_indices = @transform_11, window_bounds = array<i64: 8, 16>}, {pipeline_mode = #tpu.pipeline_mode<synchronous>, transform_indices = @transform_12, window_bounds = array<i64: 16, 8>}, {pipeline_mode = #tpu.pipeline_mode<synchronous>, transform_indices = @transform_13, window_bounds = array<i64: 128, 1>}, {pipeline_mode = #tpu.pipeline_mode<synchronous>, transform_indices = @transform_14, window_bounds = array<i64: 1, 128>}, {transform_indices = @transform_15, window_bounds = array<i64: 1, 16, 128>}]} {
    %c0 = arith.constant 0 : index
    %c0_0 = arith.constant 0 : index
    %0 = vector.load %arg12[%c0, %c0_0] : memref<8x16xf32, #tpu.memory_space<vmem>>, vector<8x16xf32>
    %c0_1 = arith.constant 0 : index
    %c0_2 = arith.constant 0 : index
    %1 = vector.load %arg13[%c0_1, %c0_2] : memref<16x8xf32, #tpu.memory_space<vmem>>, vector<16x8xf32>
    %c0_3 = arith.constant 0 : index
    %c0_4 = arith.constant 0 : index
    %2 = vector.load %arg14[%c0_3, %c0_4] : memref<128x1xf32, #tpu.memory_space<vmem>>, vector<128x1xf32>
    %c0_5 = arith.constant 0 : index
    %c0_6 = arith.constant 0 : index
    %3 = vector.load %arg15[%c0_5, %c0_6] : memref<1x128xf32, #tpu.memory_space<vmem>>, vector<1x128xf32>
    %c0_7 = arith.constant 0 : index
    %c0_8 = arith.constant 0 : index
    %c0_9 = arith.constant 0 : index
    %4 = vector.load %arg1[%c0_7, %c0_8, %c0_9] : memref<1x8x128xf32, #tpu.memory_space<vmem>>, vector<1x8x128xf32>
    %5 = vector.shape_cast %4 : vector<1x8x128xf32> to vector<8x128xf32>
    %cst = arith.constant 0.000000e+00 : f32
    %6 = vector.broadcast %cst : f32 to vector<8x2xf32>
    %7 = vector.extract_strided_slice %5 {offsets = [0, 0], sizes = [8, 126], strides = [1, 1]} : vector<8x128xf32> to vector<8x126xf32>
    %8 = tpu.concatenate %6, %7 in 1 : vector<8x2xf32>, vector<8x126xf32> -> vector<8x128xf32>
    %cst_10 = arith.constant 0.000000e+00 : f32
    %9 = vector.broadcast %cst_10 : f32 to vector<8x1xf32>
    %10 = vector.extract_strided_slice %5 {offsets = [0, 0], sizes = [8, 127], strides = [1, 1]} : vector<8x128xf32> to vector<8x127xf32>
    %11 = tpu.concatenate %9, %10 in 1 : vector<8x1xf32>, vector<8x127xf32> -> vector<8x128xf32>
    %cst_11 = arith.constant 0.000000e+00 : f32
    %12 = vector.broadcast %cst_11 : f32 to vector<8x1xf32>
    %13 = vector.extract_strided_slice %5 {offsets = [0, 1], sizes = [8, 127], strides = [1, 1]} : vector<8x128xf32> to vector<8x127xf32>
    %14 = tpu.concatenate %13, %12 in 1 : vector<8x127xf32>, vector<8x1xf32> -> vector<8x128xf32>
    %cst_12 = arith.constant 0.000000e+00 : f32
    %15 = vector.broadcast %cst_12 : f32 to vector<8x2xf32>
    %16 = vector.extract_strided_slice %5 {offsets = [0, 2], sizes = [8, 126], strides = [1, 1]} : vector<8x128xf32> to vector<8x126xf32>
    %17 = tpu.concatenate %16, %15 in 1 : vector<8x126xf32>, vector<8x2xf32> -> vector<8x128xf32>
    %18 = tpu.concatenate %8, %11, %5, %14, %17 in 0 : vector<8x128xf32>, vector<8x128xf32>, vector<8x128xf32>, vector<8x128xf32>, vector<8x128xf32> -> vector<40x128xf32>
    %c0_13 = arith.constant 0 : index
    %c0_14 = arith.constant 0 : index
    %19 = vector.load %arg2[%c0_13, %c0_14] : memref<16x40xf32, #tpu.memory_space<vmem>>, vector<16x40xf32>
    %cst_15 = arith.constant dense<0.000000e+00> : vector<16x128xf32>
    %20 = tpu.matmul %19, %18, %cst_15 {dimension_numbers = #tpu.dot_dimension_numbers<[1], [0], [0], [1], [0, 0, 1, 1], [], []>} : vector<16x40xf32>, vector<40x128xf32>, vector<16x128xf32> -> vector<16x128xf32>
    %c0_16 = arith.constant 0 : index
    %c0_17 = arith.constant 0 : index
    %21 = vector.load %arg3[%c0_16, %c0_17] : memref<16x1xf32, #tpu.memory_space<vmem>>, vector<16x1xf32>
    %22 = vector.broadcast %21 : vector<16x1xf32> to vector<16x128xf32>
    %23 = arith.addf %20, %22 : vector<16x128xf32>
    %c0_18 = arith.constant 0 : index
    %c0_19 = arith.constant 0 : index
    %24 = vector.load %arg4[%c0_18, %c0_19] : memref<16x1xf32, #tpu.memory_space<vmem>>, vector<16x1xf32>
    %c0_20 = arith.constant 0 : index
    %c0_21 = arith.constant 0 : index
    %25 = vector.load %arg5[%c0_20, %c0_21] : memref<16x1xf32, #tpu.memory_space<vmem>>, vector<16x1xf32>
    %cst_22 = arith.constant dense<0.000000e+00> : vector<16x1xf32>
    %26 = tpu.matmul %23, %2, %cst_22 {dimension_numbers = #tpu.dot_dimension_numbers<[1], [0], [0], [1], [0, 0, 1, 1], [], []>} : vector<16x128xf32>, vector<128x1xf32>, vector<16x1xf32> -> vector<16x1xf32>
    %27 = arith.mulf %23, %23 : vector<16x128xf32>
    %cst_23 = arith.constant dense<0.000000e+00> : vector<16x1xf32>
    %28 = tpu.matmul %27, %2, %cst_23 {dimension_numbers = #tpu.dot_dimension_numbers<[1], [0], [0], [1], [0, 0, 1, 1], [], []>} : vector<16x128xf32>, vector<128x1xf32>, vector<16x1xf32> -> vector<16x1xf32>
    %cst_24 = arith.constant dense<0.000000e+00> : vector<8x1xf32>
    %29 = tpu.matmul %0, %26, %cst_24 {dimension_numbers = #tpu.dot_dimension_numbers<[1], [0], [0], [1], [0, 0, 1, 1], [], []>} : vector<8x16xf32>, vector<16x1xf32>, vector<8x1xf32> -> vector<8x1xf32>
    %cst_25 = arith.constant dense<0.000000e+00> : vector<8x1xf32>
    %30 = tpu.matmul %0, %28, %cst_25 {dimension_numbers = #tpu.dot_dimension_numbers<[1], [0], [0], [1], [0, 0, 1, 1], [], []>} : vector<8x16xf32>, vector<16x1xf32>, vector<8x1xf32> -> vector<8x1xf32>
    %cst_26 = arith.constant 3.125000e-02 : f32
    %31 = vector.broadcast %cst_26 : f32 to vector<8x1xf32>
    %32 = arith.mulf %29, %31 : vector<8x1xf32>
    %cst_27 = arith.constant 3.125000e-02 : f32
    %33 = vector.broadcast %cst_27 : f32 to vector<8x1xf32>
    %34 = arith.mulf %30, %33 : vector<8x1xf32>
    %35 = arith.mulf %32, %32 : vector<8x1xf32>
    %36 = arith.subf %34, %35 : vector<8x1xf32>
    %cst_28 = arith.constant 0.000000e+00 : f32
    %37 = vector.broadcast %cst_28 : f32 to vector<8x1xf32>
    %38 = arith.maximumf %36, %37 : vector<8x1xf32>
    %cst_29 = arith.constant 9.99999974E-6 : f32
    %39 = vector.broadcast %cst_29 : f32 to vector<8x1xf32>
    %40 = arith.addf %38, %39 : vector<8x1xf32>
    %41 = math.rsqrt %40 : vector<8x1xf32>
    %cst_30 = arith.constant dense<0.000000e+00> : vector<16x1xf32>
    %42 = tpu.matmul %1, %32, %cst_30 {dimension_numbers = #tpu.dot_dimension_numbers<[1], [0], [0], [1], [0, 0, 1, 1], [], []>} : vector<16x8xf32>, vector<8x1xf32>, vector<16x1xf32> -> vector<16x1xf32>
    %cst_31 = arith.constant dense<0.000000e+00> : vector<16x1xf32>
    %43 = tpu.matmul %1, %41, %cst_31 {dimension_numbers = #tpu.dot_dimension_numbers<[1], [0], [0], [1], [0, 0, 1, 1], [], []>} : vector<16x8xf32>, vector<8x1xf32>, vector<16x1xf32> -> vector<16x1xf32>
    %44 = arith.mulf %24, %43 : vector<16x1xf32>
    %45 = arith.mulf %42, %44 : vector<16x1xf32>
    %46 = arith.subf %25, %45 : vector<16x1xf32>
    %47 = vector.broadcast %44 : vector<16x1xf32> to vector<16x128xf32>
    %48 = vector.broadcast %3 : vector<1x128xf32> to vector<16x128xf32>
    %49 = arith.mulf %47, %48 : vector<16x128xf32>
    %50 = vector.broadcast %46 : vector<16x1xf32> to vector<16x128xf32>
    %51 = vector.broadcast %3 : vector<1x128xf32> to vector<16x128xf32>
    %52 = arith.mulf %50, %51 : vector<16x128xf32>
    %53 = arith.mulf %23, %49 : vector<16x128xf32>
    %54 = arith.addf %53, %52 : vector<16x128xf32>
    %cst_32 = arith.constant 2.000000e+01 : f32
    %55 = vector.broadcast %cst_32 : f32 to vector<16x128xf32>
    %56 = arith.minimumf %54, %55 : vector<16x128xf32>
    %57 = math.exp %56 : vector<16x128xf32>
    %cst_33 = arith.constant 2.000000e+00 : f32
    %58 = vector.broadcast %cst_33 : f32 to vector<16x128xf32>
    %59 = arith.addf %57, %58 : vector<16x128xf32>
    %60 = arith.mulf %57, %59 : vector<16x128xf32>
    %cst_34 = arith.constant 2.000000e+00 : f32
    %61 = vector.broadcast %cst_34 : f32 to vector<16x128xf32>
    %62 = arith.addf %60, %61 : vector<16x128xf32>
    %63 = tpu.reciprocal %62 {approx = true} : vector<16x128xf32> -> vector<16x128xf32>
    %64 = arith.mulf %62, %63 : vector<16x128xf32>
    %cst_35 = arith.constant 2.000000e+00 : f32
    %65 = vector.broadcast %cst_35 : f32 to vector<16x128xf32>
    %66 = arith.subf %65, %64 : vector<16x128xf32>
    %67 = arith.mulf %63, %66 : vector<16x128xf32>
    %cst_36 = arith.constant 2.000000e+01 : f32
    %68 = vector.broadcast %cst_36 : f32 to vector<16x128xf32>
    %69 = arith.cmpf ogt, %54, %68 : vector<16x128xf32>
    %70 = arith.mulf %54, %60 : vector<16x128xf32>
    %71 = arith.mulf %70, %67 : vector<16x128xf32>
    %72 = arith.select %69, %54, %71 : vector<16x128xi1>, vector<16x128xf32>
    %c0_37 = arith.constant 0 : index
    %c0_38 = arith.constant 0 : index
    %73 = vector.load %arg7[%c0_37, %c0_38] : memref<16x1xf32, #tpu.memory_space<vmem>>, vector<16x1xf32>
    %c0_39 = arith.constant 0 : index
    %c0_40 = arith.constant 0 : index
    %74 = vector.load %arg6[%c0_39, %c0_40] : memref<16x80xf32, #tpu.memory_space<vmem>>, vector<16x16xf32>
    %cst_41 = arith.constant 0.000000e+00 : f32
    %75 = vector.broadcast %cst_41 : f32 to vector<16x2xf32>
    %76 = vector.extract_strided_slice %72 {offsets = [0, 0], sizes = [16, 126], strides = [1, 1]} : vector<16x128xf32> to vector<16x126xf32>
    %77 = tpu.concatenate %75, %76 in 1 : vector<16x2xf32>, vector<16x126xf32> -> vector<16x128xf32>
    %cst_42 = arith.constant dense<0.000000e+00> : vector<16x128xf32>
    %78 = tpu.matmul %74, %77, %cst_42 {dimension_numbers = #tpu.dot_dimension_numbers<[1], [0], [0], [1], [0, 0, 1, 1], [], []>} : vector<16x16xf32>, vector<16x128xf32>, vector<16x128xf32> -> vector<16x128xf32>
    %79 = vector.broadcast %73 : vector<16x1xf32> to vector<16x128xf32>
    %80 = arith.addf %79, %78 : vector<16x128xf32>
    %c0_43 = arith.constant 0 : index
    %c16 = arith.constant 16 : index
    %81 = vector.load %arg6[%c0_43, %c16] : memref<16x80xf32, #tpu.memory_space<vmem>>, vector<16x16xf32>
    %cst_44 = arith.constant 0.000000e+00 : f32
    %82 = vector.broadcast %cst_44 : f32 to vector<16x1xf32>
    %83 = vector.extract_strided_slice %72 {offsets = [0, 0], sizes = [16, 127], strides = [1, 1]} : vector<16x128xf32> to vector<16x127xf32>
    %84 = tpu.concatenate %82, %83 in 1 : vector<16x1xf32>, vector<16x127xf32> -> vector<16x128xf32>
    %cst_45 = arith.constant dense<0.000000e+00> : vector<16x128xf32>
    %85 = tpu.matmul %81, %84, %cst_45 {dimension_numbers = #tpu.dot_dimension_numbers<[1], [0], [0], [1], [0, 0, 1, 1], [], []>} : vector<16x16xf32>, vector<16x128xf32>, vector<16x128xf32> -> vector<16x128xf32>
    %86 = arith.addf %80, %85 : vector<16x128xf32>
    %c0_46 = arith.constant 0 : index
    %c32 = arith.constant 32 : index
    %87 = vector.load %arg6[%c0_46, %c32] : memref<16x80xf32, #tpu.memory_space<vmem>>, vector<16x16xf32>
    %cst_47 = arith.constant dense<0.000000e+00> : vector<16x128xf32>
    %88 = tpu.matmul %87, %72, %cst_47 {dimension_numbers = #tpu.dot_dimension_numbers<[1], [0], [0], [1], [0, 0, 1, 1], [], []>} : vector<16x16xf32>, vector<16x128xf32>, vector<16x128xf32> -> vector<16x128xf32>
    %89 = arith.addf %86, %88 : vector<16x128xf32>
    %c0_48 = arith.constant 0 : index
    %c48 = arith.constant 48 : index
    %90 = vector.load %arg6[%c0_48, %c48] : memref<16x80xf32, #tpu.memory_space<vmem>>, vector<16x16xf32>
    %cst_49 = arith.constant 0.000000e+00 : f32
    %91 = vector.broadcast %cst_49 : f32 to vector<16x1xf32>
    %92 = vector.extract_strided_slice %72 {offsets = [0, 1], sizes = [16, 127], strides = [1, 1]} : vector<16x128xf32> to vector<16x127xf32>
    %93 = tpu.concatenate %92, %91 in 1 : vector<16x127xf32>, vector<16x1xf32> -> vector<16x128xf32>
    %cst_50 = arith.constant dense<0.000000e+00> : vector<16x128xf32>
    %94 = tpu.matmul %90, %93, %cst_50 {dimension_numbers = #tpu.dot_dimension_numbers<[1], [0], [0], [1], [0, 0, 1, 1], [], []>} : vector<16x16xf32>, vector<16x128xf32>, vector<16x128xf32> -> vector<16x128xf32>
    %95 = arith.addf %89, %94 : vector<16x128xf32>
    %c0_51 = arith.constant 0 : index
    %c64 = arith.constant 64 : index
    %96 = vector.load %arg6[%c0_51, %c64] : memref<16x80xf32, #tpu.memory_space<vmem>>, vector<16x16xf32>
    %cst_52 = arith.constant 0.000000e+00 : f32
    %97 = vector.broadcast %cst_52 : f32 to vector<16x2xf32>
    %98 = vector.extract_strided_slice %72 {offsets = [0, 2], sizes = [16, 126], strides = [1, 1]} : vector<16x128xf32> to vector<16x126xf32>
    %99 = tpu.concatenate %98, %97 in 1 : vector<16x126xf32>, vector<16x2xf32> -> vector<16x128xf32>
    %cst_53 = arith.constant dense<0.000000e+00> : vector<16x128xf32>
    %100 = tpu.matmul %96, %99, %cst_53 {dimension_numbers = #tpu.dot_dimension_numbers<[1], [0], [0], [1], [0, 0, 1, 1], [], []>} : vector<16x16xf32>, vector<16x128xf32>, vector<16x128xf32> -> vector<16x128xf32>
    %101 = arith.addf %95, %100 : vector<16x128xf32>
    %c0_54 = arith.constant 0 : index
    %c0_55 = arith.constant 0 : index
    %102 = vector.load %arg8[%c0_54, %c0_55] : memref<16x1xf32, #tpu.memory_space<vmem>>, vector<16x1xf32>
    %c0_56 = arith.constant 0 : index
    %c0_57 = arith.constant 0 : index
    %103 = vector.load %arg9[%c0_56, %c0_57] : memref<16x1xf32, #tpu.memory_space<vmem>>, vector<16x1xf32>
    %cst_58 = arith.constant dense<0.000000e+00> : vector<16x1xf32>
    %104 = tpu.matmul %101, %2, %cst_58 {dimension_numbers = #tpu.dot_dimension_numbers<[1], [0], [0], [1], [0, 0, 1, 1], [], []>} : vector<16x128xf32>, vector<128x1xf32>, vector<16x1xf32> -> vector<16x1xf32>
    %105 = arith.mulf %101, %101 : vector<16x128xf32>
    %cst_59 = arith.constant dense<0.000000e+00> : vector<16x1xf32>
    %106 = tpu.matmul %105, %2, %cst_59 {dimension_numbers = #tpu.dot_dimension_numbers<[1], [0], [0], [1], [0, 0, 1, 1], [], []>} : vector<16x128xf32>, vector<128x1xf32>, vector<16x1xf32> -> vector<16x1xf32>
    %cst_60 = arith.constant dense<0.000000e+00> : vector<8x1xf32>
    %107 = tpu.matmul %0, %104, %cst_60 {dimension_numbers = #tpu.dot_dimension_numbers<[1], [0], [0], [1], [0, 0, 1, 1], [], []>} : vector<8x16xf32>, vector<16x1xf32>, vector<8x1xf32> -> vector<8x1xf32>
    %cst_61 = arith.constant dense<0.000000e+00> : vector<8x1xf32>
    %108 = tpu.matmul %0, %106, %cst_61 {dimension_numbers = #tpu.dot_dimension_numbers<[1], [0], [0], [1], [0, 0, 1, 1], [], []>} : vector<8x16xf32>, vector<16x1xf32>, vector<8x1xf32> -> vector<8x1xf32>
    %cst_62 = arith.constant 3.125000e-02 : f32
    %109 = vector.broadcast %cst_62 : f32 to vector<8x1xf32>
    %110 = arith.mulf %107, %109 : vector<8x1xf32>
    %cst_63 = arith.constant 3.125000e-02 : f32
    %111 = vector.broadcast %cst_63 : f32 to vector<8x1xf32>
    %112 = arith.mulf %108, %111 : vector<8x1xf32>
    %113 = arith.mulf %110, %110 : vector<8x1xf32>
    %114 = arith.subf %112, %113 : vector<8x1xf32>
    %cst_64 = arith.constant 0.000000e+00 : f32
    %115 = vector.broadcast %cst_64 : f32 to vector<8x1xf32>
    %116 = arith.maximumf %114, %115 : vector<8x1xf32>
    %cst_65 = arith.constant 9.99999974E-6 : f32
    %117 = vector.broadcast %cst_65 : f32 to vector<8x1xf32>
    %118 = arith.addf %116, %117 : vector<8x1xf32>
    %119 = math.rsqrt %118 : vector<8x1xf32>
    %cst_66 = arith.constant dense<0.000000e+00> : vector<16x1xf32>
    %120 = tpu.matmul %1, %110, %cst_66 {dimension_numbers = #tpu.dot_dimension_numbers<[1], [0], [0], [1], [0, 0, 1, 1], [], []>} : vector<16x8xf32>, vector<8x1xf32>, vector<16x1xf32> -> vector<16x1xf32>
    %cst_67 = arith.constant dense<0.000000e+00> : vector<16x1xf32>
    %121 = tpu.matmul %1, %119, %cst_67 {dimension_numbers = #tpu.dot_dimension_numbers<[1], [0], [0], [1], [0, 0, 1, 1], [], []>} : vector<16x8xf32>, vector<8x1xf32>, vector<16x1xf32> -> vector<16x1xf32>
    %122 = arith.mulf %102, %121 : vector<16x1xf32>
    %123 = arith.mulf %120, %122 : vector<16x1xf32>
    %124 = arith.subf %103, %123 : vector<16x1xf32>
    %125 = vector.broadcast %122 : vector<16x1xf32> to vector<16x128xf32>
    %126 = vector.broadcast %3 : vector<1x128xf32> to vector<16x128xf32>
    %127 = arith.mulf %125, %126 : vector<16x128xf32>
    %128 = vector.broadcast %124 : vector<16x1xf32> to vector<16x128xf32>
    %129 = vector.broadcast %3 : vector<1x128xf32> to vector<16x128xf32>
    %130 = arith.mulf %128, %129 : vector<16x128xf32>
    %131 = arith.mulf %101, %127 : vector<16x128xf32>
    %132 = arith.addf %131, %130 : vector<16x128xf32>
    %cst_68 = arith.constant 2.000000e+01 : f32
    %133 = vector.broadcast %cst_68 : f32 to vector<16x128xf32>
    %134 = arith.minimumf %132, %133 : vector<16x128xf32>
    %135 = math.exp %134 : vector<16x128xf32>
    %cst_69 = arith.constant 2.000000e+00 : f32
    %136 = vector.broadcast %cst_69 : f32 to vector<16x128xf32>
    %137 = arith.addf %135, %136 : vector<16x128xf32>
    %138 = arith.mulf %135, %137 : vector<16x128xf32>
    %cst_70 = arith.constant 2.000000e+00 : f32
    %139 = vector.broadcast %cst_70 : f32 to vector<16x128xf32>
    %140 = arith.addf %138, %139 : vector<16x128xf32>
    %141 = tpu.reciprocal %140 {approx = true} : vector<16x128xf32> -> vector<16x128xf32>
    %142 = arith.mulf %140, %141 : vector<16x128xf32>
    %cst_71 = arith.constant 2.000000e+00 : f32
    %143 = vector.broadcast %cst_71 : f32 to vector<16x128xf32>
    %144 = arith.subf %143, %142 : vector<16x128xf32>
    %145 = arith.mulf %141, %144 : vector<16x128xf32>
    %cst_72 = arith.constant 2.000000e+01 : f32
    %146 = vector.broadcast %cst_72 : f32 to vector<16x128xf32>
    %147 = arith.cmpf ogt, %132, %146 : vector<16x128xf32>
    %148 = arith.mulf %132, %138 : vector<16x128xf32>
    %149 = arith.mulf %148, %145 : vector<16x128xf32>
    %150 = arith.select %147, %132, %149 : vector<16x128xi1>, vector<16x128xf32>
    %c0_73 = arith.constant 0 : index
    %c0_74 = arith.constant 0 : index
    %151 = vector.load %arg10[%c0_73, %c0_74] : memref<16x8xf32, #tpu.memory_space<vmem>>, vector<16x8xf32>
    %cst_75 = arith.constant dense<0.000000e+00> : vector<16x128xf32>
    %152 = tpu.matmul %151, %5, %cst_75 {dimension_numbers = #tpu.dot_dimension_numbers<[1], [0], [0], [1], [0, 0, 1, 1], [], []>} : vector<16x8xf32>, vector<8x128xf32>, vector<16x128xf32> -> vector<16x128xf32>
    %c0_76 = arith.constant 0 : index
    %c0_77 = arith.constant 0 : index
    %153 = vector.load %arg11[%c0_76, %c0_77] : memref<16x1xf32, #tpu.memory_space<vmem>>, vector<16x1xf32>
    %154 = vector.broadcast %153 : vector<16x1xf32> to vector<16x128xf32>
    %155 = arith.addf %152, %154 : vector<16x128xf32>
    %156 = arith.addf %150, %155 : vector<16x128xf32>
    %c0_78 = arith.constant 0 : index
    %c0_79 = arith.constant 0 : index
    %c0_80 = arith.constant 0 : index
    %157 = vector.load %arg16[%c0_78, %c0_79, %c0_80] : memref<1x16x128xf32, #tpu.memory_space<vmem>>, vector<1x16x128xf32>
    %158 = vector.shape_cast %157 : vector<1x16x128xf32> to vector<16x128xf32>
    %159 = vector.shape_cast %156 : vector<16x128xf32> to vector<1x16x128xf32>
    tpu.vector_store %arg16[%c0_78, %c0_79, %c0_80], %159 {strides = array<i32>} : memref<1x16x128xf32, #tpu.memory_space<vmem>>, vector<1x16x128xf32>,
    return
  }
  func.func @transform_0(%arg0: i32) -> (i32, i32, i32) {
    %c0_i32 = arith.constant 0 : i32
    %c0_i32_0 = arith.constant 0 : i32
    %c0_i32_1 = arith.constant 0 : i32
    return %arg0, %c0_i32, %c0_i32_0 : i32, i32, i32
  }
  func.func @transform_1(%arg0: i32) -> (i32, i32) {
    %c0_i32 = arith.constant 0 : i32
    %c0_i32_0 = arith.constant 0 : i32
    %c0_i32_1 = arith.constant 0 : i32
    return %c0_i32, %c0_i32_0 : i32, i32
  }
  func.func @transform_2(%arg0: i32) -> (i32, i32) {
    %c0_i32 = arith.constant 0 : i32
    %c0_i32_0 = arith.constant 0 : i32
    %c0_i32_1 = arith.constant 0 : i32
    return %c0_i32, %c0_i32_0 : i32, i32
  }
  func.func @transform_3(%arg0: i32) -> (i32, i32) {
    %c0_i32 = arith.constant 0 : i32
    %c0_i32_0 = arith.constant 0 : i32
    %c0_i32_1 = arith.constant 0 : i32
    return %c0_i32, %c0_i32_0 : i32, i32
  }
  func.func @transform_4(%arg0: i32) -> (i32, i32) {
    %c0_i32 = arith.constant 0 : i32
    %c0_i32_0 = arith.constant 0 : i32
    %c0_i32_1 = arith.constant 0 : i32
    return %c0_i32, %c0_i32_0 : i32, i32
  }
  func.func @transform_5(%arg0: i32) -> (i32, i32) {
    %c0_i32 = arith.constant 0 : i32
    %c0_i32_0 = arith.constant 0 : i32
    %c0_i32_1 = arith.constant 0 : i32
    return %c0_i32, %c0_i32_0 : i32, i32
  }
  func.func @transform_6(%arg0: i32) -> (i32, i32) {
    %c0_i32 = arith.constant 0 : i32
    %c0_i32_0 = arith.constant 0 : i32
    %c0_i32_1 = arith.constant 0 : i32
    return %c0_i32, %c0_i32_0 : i32, i32
  }
  func.func @transform_7(%arg0: i32) -> (i32, i32) {
    %c0_i32 = arith.constant 0 : i32
    %c0_i32_0 = arith.constant 0 : i32
    %c0_i32_1 = arith.constant 0 : i32
    return %c0_i32, %c0_i32_0 : i32, i32
  }
  func.func @transform_8(%arg0: i32) -> (i32, i32) {
    %c0_i32 = arith.constant 0 : i32
    %c0_i32_0 = arith.constant 0 : i32
    %c0_i32_1 = arith.constant 0 : i32
    return %c0_i32, %c0_i32_0 : i32, i32
  }
  func.func @transform_9(%arg0: i32) -> (i32, i32) {
    %c0_i32 = arith.constant 0 : i32
    %c0_i32_0 = arith.constant 0 : i32
    %c0_i32_1 = arith.constant 0 : i32
    return %c0_i32, %c0_i32_0 : i32, i32
  }
  func.func @transform_10(%arg0: i32) -> (i32, i32) {
    %c0_i32 = arith.constant 0 : i32
    %c0_i32_0 = arith.constant 0 : i32
    %c0_i32_1 = arith.constant 0 : i32
    return %c0_i32, %c0_i32_0 : i32, i32
  }
  func.func @transform_11(%arg0: i32) -> (i32, i32) {
    %c0_i32 = arith.constant 0 : i32
    %c0_i32_0 = arith.constant 0 : i32
    %c0_i32_1 = arith.constant 0 : i32
    return %c0_i32, %c0_i32_0 : i32, i32
  }
  func.func @transform_12(%arg0: i32) -> (i32, i32) {
    %c0_i32 = arith.constant 0 : i32
    %c0_i32_0 = arith.constant 0 : i32
    %c0_i32_1 = arith.constant 0 : i32
    return %c0_i32, %c0_i32_0 : i32, i32
  }
  func.func @transform_13(%arg0: i32) -> (i32, i32) {
    %c0_i32 = arith.constant 0 : i32
    %c0_i32_0 = arith.constant 0 : i32
    %c0_i32_1 = arith.constant 0 : i32
    return %c0_i32, %c0_i32_0 : i32, i32
  }
  func.func @transform_14(%arg0: i32) -> (i32, i32) {
    %c0_i32 = arith.constant 0 : i32
    %c0_i32_0 = arith.constant 0 : i32
    %c0_i32_1 = arith.constant 0 : i32
    return %c0_i32, %c0_i32_0 : i32, i32
  }
  func.func @transform_15(%arg0: i32) -> (i32, i32, i32) {
    %c0_i32 = arith.constant 0 : i32
    %c0_i32_0 = arith.constant 0 : i32
    %c0_i32_1 = arith.constant 0 : i32
    return %arg0, %c0_i32, %c0_i32_0 : i32, i32, i32
  }
}

</mosaic_0001>

<bundles_post_ra>
// kernel: residual_conv_block.1
= control target key start
LH: loop header
LB: loop body
LE: loop exit
PB: predicated region body
PF: predicated region fallthrough
CT: control target
= control target key end

     0   :  { %s2865_s18 = smov 0   ;;  %s3340_s0 = inlined_call_operand.vmem [shape: f32[2,8,128], index: 0, kind: input, shape index: {}]   ;;  %s3341_s1 = inlined_call_operand.vmem [shape: f32[16,40], index: 1, kind: input, shape index: {}]   ;;  %s3342_s2 = inlined_call_operand.vmem [shape: f32[16,1], index: 2, kind: input, shape index: {}]   ;;  %s3343_s3 = inlined_call_operand.vmem [shape: f32[16,1], index: 3, kind: input, shape index: {}]   ;;  %s3344_s4 = inlined_call_operand.vmem [shape: f32[16,1], index: 4, kind: input, shape index: {}]   ;;  %s3345_s5 = inlined_call_operand.vmem [shape: f32[16,80], index: 5, kind: input, shape index: {}]   ;;  %s3346_s6 = inlined_call_operand.vmem [shape: f32[16,1], index: 6, kind: input, shape index: {}]   ;;  %s3347_s7 = inlined_call_operand.vmem [shape: f32[16,1], index: 7, kind: input, shape index: {}]   ;;  %s3348_s8 = inlined_call_operand.vmem [shape: f32[16,1], index: 8, kind: input, shape index: {}]   ;;  %s3349_s9 = inlined_call_operand.vmem [shape: f32[16,8], index: 9, kind: input, shape index: {}]   ;;  %s3350_s10 = inlined_call_operand.vmem [shape: f32[16,1], index: 10, kind: input, shape index: {}]   ;;  %s3351_s11 = inlined_call_operand.vmem [shape: f32[8,16], index: 11, kind: input, shape index: {}]   ;;  %s3352_s12 = inlined_call_operand.vmem [shape: f32[16,8], index: 12, kind: input, shape index: {}]   ;;  %s3353_s13 = inlined_call_operand.vmem [shape: f32[128,1], index: 13, kind: input, shape index: {}]   ;;  %s3354_s14 = inlined_call_operand.vmem [shape: f32[1,128], index: 14, kind: input, shape index: {}]   ;;  %s3355_s15 = inlined_call_operand.vmem [shape: f32[2,16,128], index: 15, kind: output, shape index: {}]  }
   0x1 LB: > { %s2302_s19 = sadd.s32 4294967295, %s2772_s18   ;;  %p2306_p0 = scmp.ge.s32.totalorder %s2772_s18, 1  ;;  %s2772_s18 = sphi %s2865_s18, %s25_s18  }
   0x2   : > { %p436_p1 = scmp.lt.s32.totalorder %s2772_s18, 3 }
   0x4   : > { %p437_p2 = pnand %p2306_p0, %p436_p1 }
   0x5   : > { %p483_p3 = scmp.lt.s32.totalorder (!%p437_p2), %s2302_s19, 1  ;;  %s2774_s26 = smov (!%p437_p2), 126  }
   0x6   : > { %440 = sbr.rel (%p437_p2) target bundleno = 2256 (0x8d0), region = 80  ;;  %s2775_s27 = smov (!%p437_p2), 1  }
   0x7   : > { %s2777_s17 = smov (!%p437_p2), 127   ;;  %s2781_s28 = smov (!%p437_p2), 112  }
   0x8   : > { %s2782_s16 = smov (!%p437_p2), 96   ;;  %s2783_s21 = smov (!%p437_p2), 80  }
   0x9   : > { %s2784_s24 = smov (!%p437_p2), 64  }
   0xb   : > { %s3361_s19 = smov (!%p483_p3, %s2302_s19), 1  ;;  %v534_v0 = vld [vmem:[%s3341_s1] sm:$0xff]  ;;  %vm548_vm0 = vcmask 326656   ;;  %v2892_v2 = vld [vmem:[%s3353_s13 + $0x78] sm:$0xff]  ;;  %v2776_v3 = vmov 0   ;;  %v2898_v4 = vld [vmem:[%s3353_s13 + $0x70] sm:$0xff] }
   0xc   : > { %s2307_s20 = sshll.u32 %s3361_s19, 3  ;;  %2494 = vmatprep.mubr.msk.f32.mxu0 %vm548_vm0, %v534_v0  ;;  %2745 = vset.pattern.permute.xlu1 %v2776_v3  ;;  %v2908_v5 = vld [vmem:[%s3353_s13 + $0x68] sm:$0xff]  ;;  %v536_v7 = vld [vmem:[%s3342_s2] sm:$0xff]  ;;  %v2928_v9 = vld [vmem:[%s3353_s13 + $0x58] sm:$0xff]  ;;  %vm532_vm1 = vcmask 1031168   ;;  %vm527_vm2 = vcmask 1039360  }
   0xd   : > { %s486_s25 = scalar_lea.vmem %s3340_s0, %s2307_s20  ;;  %2744 = vset.pattern.permute.xlu0 %v2776_v3  ;;  %2497 = vmatprep.subr.mxu1 %v2892_v2  ;;  %s2778_s20 = smov 2   ;;  %v537_v6 = vld [vmem:[%s3342_s2 + $0x8] sm:$0xff]  ;;  %v2922_v8 = vld [vmem:[%s3353_s13 + $0x60] sm:$0xff]  ;;  %v2935_v10 = vld [vmem:[%s3353_s13 + $0x50] sm:$0xff]  ;;  %vm522_vm3 = vcmask 7168   ;;  %vm517_vm4 = vcmask 15360  }
   0xe   : > { %v2883_v1 = vld [vmem:[%s486_s25] sm:$0xff]  ;;  %2498 = vmatpush3.msra.mxu1 %v2892_v2  ;;  %v2942_v11 = vld [vmem:[%s3353_s13 + $0x48] sm:$0xff]  ;;  %v2956_v13 = vld [vmem:[%s3353_s13 + $0x38] sm:$0xff]  ;;  %v2779_v36 = vmov 0.0   ;;  %vm2780_vm7 = vmmov 0   ;;  %vm786_vm8 = vcmask 130048  }
   0xf   : > { %529 = vrot.lane.b32.xlu0 %v2883_v1, %s2774_s26  ;;  %519 = vrot.lane.b32.xlu1 %v2883_v1, %s2775_s27  ;;  %v2949_v12 = vld [vmem:[%s3353_s13 + $0x40] sm:$0xff]  ;;  %v2963_v14 = vld [vmem:[%s3353_s13 + $0x30] sm:$0xff]  ;;  %vm3001_vm5 = vmneg %vm522_vm3  ;;  %vm937_vm9 = vcmask 64512   ;;  %s2357_s30 = sshll.u32 %s3361_s19, 4 }
  0x10   : > { %2499 = vmatprep.subr.mxu1 %v2898_v4  ;;  %v2970_v15 = vld [vmem:[%s3353_s13 + $0x28] sm:$0xff]  ;;  %v2977_v16 = vld [vmem:[%s3353_s13 + $0x20] sm:$0xff]  ;;  %v2984_v17 = vld [vmem:[%s3353_s13 + $0x18] sm:$0xff]  ;;  %s491_s22 = scalar_lea.vmem %s3355_s15, %s2357_s30 }
  0x11   : > { %2500 = vmatpush3.msra.mxu1 %v2898_v4  ;;  %v2991_v18 = vld [vmem:[%s3353_s13 + $0x10] sm:$0xff]  ;;  %vm3007_vm6 = vmneg %vm517_vm4  ;;  %v535_v25 = vld [vmem:[%s3341_s1 + $0x8] sm:$0xff] }
  0x12   : > { %2501 = vmatprep.subr.mxu1 %v2908_v5  ;;  %v3054_v26 = vld [vmem:[%s3353_s13 + $0x8] sm:$0xff]  ;;  %v3062_v27 = vld [vmem:[%s3353_s13] sm:$0xff] }
  0x13   : > { %524 = vrot.lane.b32.xlu0 %v2883_v1, %s2777_s17  ;;  %514 = vrot.lane.b32.xlu1 %v2883_v1, %s2778_s20  ;;  %v3085_v38 = vld [vmem:[%s3351_s11] sm:$0xff]  ;;  %v3108_v46 = vld [vmem:[%s3352_s12 + $0x8] sm:$0xff] }
  0x14   : > { %2502 = vmatpush3.msra.mxu1 %v2908_v5  ;;  %v3099_v42 = vld [vmem:[%s3352_s12] sm:$0xff]  ;;  %v631_v55 = vld [vmem:[%s3343_s3 + $0x8] sm:$0xff] }
  0x15   : > { %2503 = vmatprep.subr.mxu1 %v2922_v8  ;;  %v630_v58 = vld [vmem:[%s3343_s3] sm:$0xff]  ;;  %v633_v61 = vld [vmem:[%s3344_s4 + $0x8] sm:$0xff] }
  0x16   : > { %2504 = vmatpush3.msra.mxu1 %v2922_v8  ;;  %v632_v3 = vld [vmem:[%s3344_s4] sm:$0xff] }
  0x17   : > { %545 = vperm.xlu1 %2745, %v537_v6   ;;  %540 = vperm.xlu0 %2744, %v536_v7  }
  0x18   : > { %2505 = vmatprep.subr.mxu1 %v2928_v9 }
  0x19   : > { %2506 = vmatpush3.msra.mxu1 %v2928_v9 }
  0x1a   : > { %2507 = vmatprep.subr.mxu1 %v2935_v10 }
  0x1b   : > { %2508 = vmatpush3.msra.mxu1 %v2935_v10 }
  0x1c   : > { %2509 = vmatprep.subr.mxu1 %v2942_v11 }
  0x1d   : > { %2510 = vmatpush3.msra.mxu1 %v2942_v11 }
  0x1e   : > { %2511 = vmatprep.subr.mxu1 %v2949_v12 }
  0x1f   : > { %2512 = vmatpush3.msra.mxu1 %v2949_v12 }
  0x20   : > { %2513 = vmatprep.subr.mxu1 %v2956_v13 }
  0x21   : > { %2514 = vmatpush3.msra.mxu1 %v2956_v13 }
  0x22   : > { %2515 = vmatprep.subr.mxu1 %v2963_v14 }
  0x23   : > { %2516 = vmatpush3.msra.mxu1 %v2963_v14 }
  0x24   : > { %2517 = vmatprep.subr.mxu1 %v2970_v15 }
  0x25   : > { %2518 = vmatpush3.msra.mxu1 %v2970_v15 }
  0x26   : > { %2519 = vmatprep.subr.mxu1 %v2977_v16 }
  0x27   : > { %2520 = vmatpush3.msra.mxu1 %v2977_v16 }
  0x28   : > { %2521 = vmatprep.subr.mxu1 %v2984_v17 }
  0x29   : > { %2522 = vmatpush3.msra.mxu1 %v2984_v17 }
  0x2a   : > { %2523 = vmatprep.subr.mxu1 %v2991_v18 }
  0x2b   : > { %2524 = vmatpush3.msra.mxu1 %v2991_v18 }
  0x2c   : > { %2525 = vmatprep.subr.mxu1 %v3054_v26 }
  0x2d   : > { %2526 = vmatpush3.msra.mxu1 %v3054_v26 }
  0x2e   : > { %2527 = vmatprep.subr.mxu1 %v3062_v27 }
  0x2f   : > { %2528 = vmatpush3.msra.mxu1 %v3062_v27 }
  0x30   : > { %2567 = vmatprep.subr.mxu1 %v2779_v36 }
  0x81   : > { %v530_v19 = vpop.permute.xlu0 %529  ;;  %v520_v20 = vpop.permute.xlu1 %519 }
  0x82   : > { %2484 = vmatprep.subr.msk.mxu0 %vm532_vm1, %v530_v19 }
  0x83   : > { %2485 = vmatpush3.msk.msra.mxu0 %vm532_vm1, %v530_v19 }
  0x85   : > { %v525_v21 = vpop.permute.xlu0 %524  ;;  %v515_v23 = vpop.permute.xlu1 %514 }
  0x86   : > { %2486 = vmatprep.subr.msk.mxu0 %vm527_vm2, %v525_v21 }
  0x87   : > { %2487 = vmatpush3.msk.msra.mxu0 %vm527_vm2, %v525_v21  ;;  %v3137_v21 = vld [vmem:[%s3345_s5 + $0x8] sm:$0xff] }
  0x88   : > { %2488 = vmatprep.subr.mxu0 %v2883_v1 }
  0x89   : > { %2489 = vmatpush3.msra.mxu0 %v2883_v1 }
  0x8a   : > { %2490 = vmatprep.subr.msk.mxu0 %vm3001_vm5, %v520_v20 }
  0x8b   : > { %2491 = vmatpush3.msk.msra.mxu0 %vm3001_vm5, %v520_v20  ;;  %v3129_v20 = vld [vmem:[%s3345_s5] sm:$0xff] }
  0x8c   : > { %2492 = vmatprep.subr.msk.mxu0 %vm3007_vm6, %v515_v23 }
  0x8d   : > { %2493 = vmatpush3.msk.msra.mxu0 %vm3007_vm6, %v515_v23  ;;  %v3147_v23 = vld [vmem:[%s3354_s14] ss:$0 sm:$0xff] }
  0x8e   : > { %2495 = vmatmul.mubr.msk.f32.vlgmr.msra.gmra.mxu0 %vm548_vm0, %v535_v25  ;;  %2532 = vmatprep.subr.mxu0 %v2892_v2 }
  0x8f   : > { %2533 = vmatpush3.msra.mxu0 %v2892_v2 }
  0x90   : > { %2534 = vmatprep.subr.mxu0 %v2898_v4 }
  0x91   : > { %2535 = vmatpush3.msra.mxu0 %v2898_v4 }
  0x92   : > { %2536 = vmatprep.subr.mxu0 %v2908_v5  ;;  %v546_v28 = vpop.permute.xlu1 %545  ;;  %v541_v30 = vpop.permute.xlu0 %540 }
  0x93   : > { %2537 = vmatpush3.msra.mxu0 %v2908_v5 }
  0x94   : > { %2538 = vmatprep.subr.mxu0 %v2922_v8 }
  0x95   : > { %2539 = vmatpush3.msra.mxu0 %v2922_v8 }
  0x96   : > { %2540 = vmatprep.subr.mxu0 %v2928_v9 }
  0x97   : > { %2541 = vmatpush3.msra.mxu0 %v2928_v9 }
  0x98   : > { %2542 = vmatprep.subr.mxu0 %v2935_v10 }
  0x99   : > { %2543 = vmatpush3.msra.mxu0 %v2935_v10 }
  0x9a   : > { %2544 = vmatprep.subr.mxu0 %v2942_v11 }
  0x9b   : > { %2545 = vmatpush3.msra.mxu0 %v2942_v11 }
  0x9c   : > { %2546 = vmatprep.subr.mxu0 %v2949_v12 }
  0x9d   : > { %2547 = vmatpush3.msra.mxu0 %v2949_v12 }
  0x9e   : > { %2548 = vmatprep.subr.mxu0 %v2956_v13 }
  0x9f   : > { %2549 = vmatpush3.msra.mxu0 %v2956_v13 }
  0xa0   : > { %2550 = vmatprep.subr.mxu0 %v2963_v14 }
  0xa1   : > { %2551 = vmatpush3.msra.mxu0 %v2963_v14 }
  0xa2   : > { %2552 = vmatprep.subr.mxu0 %v2970_v15 }
  0xa3   : > { %2553 = vmatpush3.msra.mxu0 %v2970_v15 }
  0xa4   : > { %2554 = vmatprep.subr.mxu0 %v2977_v16 }
  0xa5   : > { %2555 = vmatpush3.msra.mxu0 %v2977_v16 }
  0xa6   : > { %2556 = vmatprep.subr.mxu0 %v2984_v17 }
  0xa7   : > { %2557 = vmatpush3.msra.mxu0 %v2984_v17 }
  0xa8   : > { %2558 = vmatprep.subr.mxu0 %v2991_v18 }
  0xa9   : > { %2559 = vmatpush3.msra.mxu0 %v2991_v18 }
  0xaa   : > { %2560 = vmatprep.subr.mxu0 %v3054_v26 }
  0xab   : > { %2561 = vmatpush3.msra.mxu0 %v3054_v26 }
  0xac   : > { %2562 = vmatprep.subr.mxu0 %v3062_v27 }
  0xad   : > { %2563 = vmatpush3.msra.mxu0 %v3062_v27 }
 0x14e   : > { %v2496_v29 = vpop.f32.mrf.mxu0 }
 0x14f   : > { %v3069_v31 = vadd.f32 %v2496_v29, %v546_v28 }
 0x150   : > { %v621_v32 = vpop.f32.mrf.mxu0 }
 0x151   : > { %v3071_v33 = vadd.f32 %v621_v32, %v541_v30  ;;  %v710_v35 = vmul.f32 %v3069_v31, %v3069_v31 }
 0x153   : > { %2529 = vmatprep.mubr.f32.mxu1 %v3071_v33  ;;  %v709_v34 = vmul.f32 %v3071_v33, %v3071_v33 }
 0x154   : > { %2530 = vmatmul.mubr.f32.vlgmr.msra.gmra.mxu1 %v3069_v31 }
 0x155   : > { %2564 = vmatprep.mubr.f32.mxu0 %v709_v34  ;;  %2571 = vmatprep.mubr.msk.f32.mxu1 %vm2780_vm7, %v2779_v36 }
 0x156   : > { %2565 = vmatmul.mubr.f32.vlgmr.msra.gmra.mxu0 %v710_v35 }
 0x157   : > { %2588 = vmatprep.mubr.msk.f32.mxu0 %vm937_vm9, %v3099_v42 }
 0x214   : > { %v2531_v37 = vpop.f32.mrf.mxu1 }
 0x215   : > { %2568 = vmatpush3.msra.mxu1 %v2531_v37 }
 0x216   : > { %v700_v39 = vpop.f32.mrf.mxu1  ;;  %v2566_v40 = vpop.f32.mrf.mxu0  ;;  %2569 = vmatprep.subr.mxu1 %v2779_v36 }
 0x217   : > { %2570 = vmatpush3.msra.mxu1 %v700_v39 }
 0x218   : > { %2572 = vmatmul.mubr.msk.f32.vlgmr.msra.gmra.mxu1 %vm786_vm8, %v3085_v38  ;;  %2574 = vmatprep.subr.mxu1 %v2779_v36  ;;  %v777_v41 = vpop.f32.mrf.mxu0 }
 0x219   : > { %2575 = vmatpush3.msra.mxu1 %v2566_v40  ;;  %2578 = vmatprep.mubr.msk.f32.mxu1 %vm2780_vm7, %v2779_v36 }
 0x21a   : > { %2576 = vmatprep.subr.mxu1 %v2779_v36 }
 0x21b   : > { %2577 = vmatpush3.msra.mxu1 %v777_v41 }
 0x21c   : > { %2579 = vmatmul.mubr.msk.f32.vlgmr.msra.gmra.mxu1 %vm786_vm8, %v3085_v38 }
 0x21d   : > { %2583 = vmatprep.mubr.msk.f32.mxu1 %vm937_vm9, %v3099_v42 }
 0x2d8   : > { %v856_v43 = vpop.f32.mrf.mxu1 }
 0x2d9   : > { %v930_v44 = vmul.f32 0.03125, %v856_v43 }
 0x2da   : > { %v2573_v45 = vpop.f32.mrf.mxu1 }
 0x2db   : > { %2581 = vmatprep.subr.mxu1 %v930_v44  ;;  %v932_v49 = vmul.f32 %v930_v44, %v930_v44 }
 0x2dc   : > { %v926_v47 = vpop.f32.mrf.mxu1  ;;  %2582 = vmatpush3.msra.mxu1 %v930_v44 }
 0x2dd   : > { %v931_v48 = vmul.f32 0.03125, %v926_v47  ;;  %2584 = vmatmul.mubr.msk.f32.vlgmr.msra.gmra.mxu1 %vm937_vm9, %v3108_v46 }
 0x2de   : > { %v2580_v50 = vpop.f32.mrf.mxu1  ;;  %2595 = vmatprep.mubr.msk.f32.mxu1 %vm786_vm8, %v3129_v20 }
 0x2df   : > { %v933_v51 = vsub.f32 %v931_v48, %v932_v49 }
 0x2e1   : > { %v934_v52 = vmax.f32 %v933_v51, 0.0 }
 0x2e3   : > { %v935_v53 = vadd.f32 1e-05, %v934_v52 }
 0x2e5   : > { %2746 = vrsqrt.f32 %v935_v53 }
 0x2f2   : > { %v2747_v54 = vpop.eup %2746 }
 0x2f3   : > { %2586 = vmatprep.subr.mxu0 %v2747_v54 }
 0x2f4   : > { %2587 = vmatpush3.msra.mxu0 %v2747_v54 }
 0x2f5   : > { %2589 = vmatmul.mubr.msk.f32.vlgmr.msra.gmra.mxu0 %vm937_vm9, %v3108_v46 }
 0x39d   : > { %v2585_v56 = vpop.f32.mrf.mxu1 }
 0x39f   : > { %v1010_v0 = vpop.f32.mrf.mxu1 }
 0x3b5   : > { %v2590_v57 = vpop.f32.mrf.mxu0 }
 0x3b6   : > { %v1095_v59 = vmul.f32 %v2590_v57, %v631_v55 }
 0x3b7   : > { %v1085_v60 = vpop.f32.mrf.mxu0 }
 0x3b8   : > { %v1097_v62 = vmul.f32 %v2585_v56, %v1095_v59  ;;  %v1094_v63 = vmul.f32 %v1085_v60, %v630_v58  ;;  %1107 = vperm.xlu1 %2745, %v1095_v59  }
 0x3ba   : > { %v1096_v6 = vmul.f32 %v1094_v63, %v1010_v0  ;;  %1102 = vperm.xlu0 %2744, %v1094_v63   ;;  %v1099_v7 = vsub.f32 %v633_v61, %v1097_v62 }
 0x3bc   : > { %1125 = vperm.xlu1 %2745, %v1099_v7   ;;  %v1098_v19 = vsub.f32 %v632_v3, %v1096_v6 }
 0x3be   : > { %1120 = vperm.xlu0 %2744, %v1098_v19  }
 0x3c0   : > { %1277 = vrot.lane.b32.xlu1 %v3129_v20, %s2781_s28 }
 0x3c2   : > { %1279 = vrot.lane.b32.xlu0 %v3137_v21, %s2781_s28 }
 0x3c4   : > { %1364 = vrot.lane.b32.xlu1 %v3137_v21, %s2782_s16 }
 0x3c6   : > { %1362 = vrot.lane.b32.xlu0 %v3129_v20, %s2782_s16 }
 0x3c8   : > { %1457 = vrot.lane.b32.xlu1 %v3137_v21, %s2783_s21 }
 0x3ca   : > { %1455 = vrot.lane.b32.xlu0 %v3129_v20, %s2783_s21 }
 0x433   : > { %v1108_v25 = vpop.permute.xlu1 %1107 }
 0x434   : > { %v1117_v28 = vmul.f32 %v3147_v23, %v1108_v25 }
 0x435   : > { %v1103_v29 = vpop.permute.xlu0 %1102 }
 0x436   : > { %v1116_v30 = vmul.f32 %v3147_v23, %v1103_v29  ;;  %v1131_v34 = vmul.f32 %v1117_v28, %v3069_v31  ;;  %v1162_v28 = vld [vmem:[%s3346_s6] sm:$0xff]  ;;  %v1163_v29 = vld [vmem:[%s3346_s6 + $0x8] sm:$0xff] }
 0x437   : > { %v1126_v32 = vpop.permute.xlu1 %1125 }
 0x438   : > { %v1129_v35 = vmul.f32 %v3147_v23, %v1126_v32  ;;  %v1130_v39 = vmul.f32 %v1116_v30, %v3071_v33 }
 0x439   : > { %v1121_v37 = vpop.permute.xlu0 %1120 }
 0x43a   : > { %v1133_v40 = vadd.f32 %v1131_v34, %v1129_v35  ;;  %v1128_v41 = vmul.f32 %v3147_v23, %v1121_v37 }
 0x43b   : > { %v1278_v53 = vpop.permute.xlu1 %1277 }
 0x43c   : > { %v1135_v43 = vmin.f32 %v1133_v40, 20.0  ;;  %v1132_v44 = vadd.f32 %v1130_v39, %v1128_v41  ;;  %2602 = vmatprep.mubr.msk.f32.mxu0 %vm786_vm8, %v1278_v53  ;;  %vm1155_vm10 = vcmp.gt.f32.partialorder %v1133_v40, 20.0 }
 0x43d   : > { %v1280_v30 = vpop.permute.xlu0 %1279 }
 0x43e   : > { %v1138_v45 = vmul.f32 1.442695, %v1135_v43  ;;  %v1134_v47 = vmin.f32 %v1132_v44, 20.0  ;;  %vm1154_vm11 = vcmp.gt.f32.partialorder %v1132_v44, 20.0 }
 0x43f   : > { %v1365_v32 = vpop.permute.xlu1 %1364 }
 0x440   : > { %2748 = vpow2.f32 %v1138_v45  ;;  %v1136_v48 = vmul.f32 1.442695, %v1134_v47 }
 0x441   : > { %v1363_v34 = vpop.permute.xlu0 %1362 }
 0x442   : > { %2750 = vpow2.f32 %v1136_v48 }
 0x443   : > { %v1458_v35 = vpop.permute.xlu1 %1457 }
 0x445   : > { %v1456_v37 = vpop.permute.xlu0 %1455 }
 0x44d   : > { %v2749_v49 = vpop.eup %2748 }
 0x44e   : > { %v1141_v50 = vadd.f32 2.0, %v2749_v49 }
 0x44f   : > { %v2751_v51 = vpop.eup %2750 }
 0x450   : > { %v1143_v52 = vmul.f32 %v2749_v49, %v1141_v50  ;;  %v1140_v31 = vadd.f32 2.0, %v2751_v51 }
 0x452   : > { %v1145_v54 = vadd.f32 2.0, %v1143_v52  ;;  %v1142_v55 = vmul.f32 %v2751_v51, %v1140_v31  ;;  %v1157_v62 = vmul.f32 %v1143_v52, %v1133_v40 }
 0x454   : > { %2752 = vrcp.f32 %v1145_v54  ;;  %v1144_v33 = vadd.f32 2.0, %v1142_v55  ;;  %v1156_v6 = vmul.f32 %v1142_v55, %v1132_v44 }
 0x456   : > { %2754 = vrcp.f32 %v1144_v33 }
 0x461   : > { %v2753_v56 = vpop.eup %2752 }
 0x462   : > { %v1149_v57 = vmul.f32 %v2753_v56, %v1145_v54 }
 0x463   : > { %v2755_v58 = vpop.eup %2754 }
 0x464   : > { %v1151_v59 = vsub.f32 2.0, %v1149_v57  ;;  %v1148_v60 = vmul.f32 %v2755_v58, %v1144_v33 }
 0x466   : > { %v1153_v61 = vmul.f32 %v2753_v56, %v1151_v59  ;;  %v1150_v63 = vsub.f32 2.0, %v1148_v60 }
 0x468   : > { %v1159_v0 = vmul.f32 %v1157_v62, %v1153_v61  ;;  %v1152_v3 = vmul.f32 %v2755_v58, %v1150_v63 }
 0x46a   : > { %v1158_v7 = vmul.f32 %v1156_v6, %v1152_v3  ;;  %v1161_v19 = vsel %vm1155_vm10, %v1133_v40, %v1159_v0 }
 0x46b   : > { %1170 = vrot.lane.b32.xlu1 %v1161_v19, %s2778_s20 }
 0x46c   : > { %v1160_v25 = vsel %vm1154_vm11, %v1132_v44, %v1158_v7 }
 0x46d   : > { %1168 = vrot.lane.b32.xlu0 %v1160_v25, %s2778_s20 }
 0x46f   : > { %1271 = vrot.lane.b32.xlu1 %v1161_v19, %s2775_s27 }
 0x471   : > { %1269 = vrot.lane.b32.xlu0 %v1160_v25, %s2775_s27 }
 0x473   : > { %1449 = vrot.lane.b32.xlu1 %v1161_v19, %s2777_s17 }
 0x475   : > { %1447 = vrot.lane.b32.xlu0 %v1160_v25, %s2777_s17 }
 0x477   : > { %1542 = vrot.lane.b32.xlu1 %v1161_v19, %s2774_s26 }
 0x479   : > { %1540 = vrot.lane.b32.xlu0 %v1160_v25, %s2774_s26 }
 0x47b   : > { %1548 = vrot.lane.b32.xlu1 %v3129_v20, %s2784_s24 }
 0x47d   : > { %1550 = vrot.lane.b32.xlu0 %v3137_v21, %s2784_s24 }
 0x47f   : > { %1259 = vperm.xlu1 %2745, %v1162_v28  }
 0x481   : > { %1264 = vperm.xlu0 %2744, %v1163_v29   ;;  %v1636_v29 = vld [vmem:[%s3348_s8 + $0x8] sm:$0xff] }
 0x4dd   : > { %v1171_v39 = vpop.permute.xlu1 %1170 }
 0x4de   : > { %2591 = vmatprep.subr.msk.mxu1 %vm3007_vm6, %v1171_v39 }
 0x4df   : > { %2592 = vmatpush3.msk.msra.mxu1 %vm3007_vm6, %v1171_v39  ;;  %v1169_v20 = vpop.permute.xlu0 %1168 }
 0x4e0   : > { %2593 = vmatprep.subr.msk.mxu1 %vm3007_vm6, %v1169_v20 }
 0x4e1   : > { %v1272_v40 = vpop.permute.xlu1 %1271  ;;  %2594 = vmatpush3.msk.msra.mxu1 %vm3007_vm6, %v1169_v20 }
 0x4e2   : > { %2596 = vmatmul.mubr.msk.f32.vlgmr.msra.gmra.mxu1 %vm786_vm8, %v3137_v21  ;;  %2598 = vmatprep.subr.msk.mxu0 %vm3001_vm5, %v1272_v40 }
 0x4e3   : > { %2605 = vmatprep.subr.mxu1 %v1161_v19  ;;  %2599 = vmatpush3.msk.msra.mxu0 %vm3001_vm5, %v1272_v40  ;;  %v1270_v41 = vpop.permute.xlu0 %1269  ;;  %v2151_v40 = vld [vmem:[%s3350_s10 + $0x8] sm:$0xff] }
 0x4e4   : > { %2606 = vmatpush3.msra.mxu1 %v1161_v19  ;;  %2609 = vmatprep.mubr.msk.f32.mxu1 %vm786_vm8, %v1363_v34 }
 0x4e5   : > { %2600 = vmatprep.subr.msk.mxu0 %vm3001_vm5, %v1270_v41  ;;  %2607 = vmatprep.subr.mxu1 %v1160_v25  ;;  %v1450_v24 = vpop.permute.xlu1 %1449 }
 0x4e6   : > { %2601 = vmatpush3.msk.msra.mxu0 %vm3001_vm5, %v1270_v41  ;;  %2608 = vmatpush3.msra.mxu1 %v1160_v25  ;;  %v1633_v25 = vld [vmem:[%s3347_s7] sm:$0xff] }
 0x4e7   : > { %2603 = vmatmul.mubr.msk.f32.vlgmr.msra.gmra.mxu0 %vm786_vm8, %v1280_v30  ;;  %2610 = vmatmul.mubr.msk.f32.vlgmr.msra.gmra.mxu1 %vm786_vm8, %v1365_v32  ;;  %v1448_v21 = vpop.permute.xlu0 %1447  ;;  %v2150_v41 = vld [vmem:[%s3350_s10] sm:$0xff] }
 0x4e8   : > { %2612 = vmatprep.subr.msk.mxu0 %vm527_vm2, %v1450_v24  ;;  %2616 = vmatprep.mubr.msk.f32.mxu0 %vm786_vm8, %v1456_v37 }
 0x4e9   : > { %2613 = vmatpush3.msk.msra.mxu0 %vm527_vm2, %v1450_v24  ;;  %v1543_v43 = vpop.permute.xlu1 %1542 }
 0x4ea   : > { %2614 = vmatprep.subr.msk.mxu0 %vm527_vm2, %v1448_v21  ;;  %2619 = vmatprep.subr.msk.mxu1 %vm532_vm1, %v1543_v43 }
 0x4eb   : > { %2615 = vmatpush3.msk.msra.mxu0 %vm527_vm2, %v1448_v21  ;;  %2620 = vmatpush3.msk.msra.mxu1 %vm532_vm1, %v1543_v43  ;;  %v1541_v22 = vpop.permute.xlu0 %1540 }
 0x4ec   : > { %2617 = vmatmul.mubr.msk.f32.vlgmr.msra.gmra.mxu0 %vm786_vm8, %v1458_v35  ;;  %2621 = vmatprep.subr.msk.mxu1 %vm532_vm1, %v1541_v22 }
 0x4ed   : > { %2622 = vmatpush3.msk.msra.mxu1 %vm532_vm1, %v1541_v22  ;;  %v1549_v44 = vpop.permute.xlu1 %1548  ;;  %2626 = vmatprep.subr.mxu0 %v2892_v2 }
 0x4ee   : > { %2623 = vmatprep.mubr.msk.f32.mxu1 %vm786_vm8, %v1549_v44  ;;  %2627 = vmatpush3.msra.mxu0 %v2892_v2 }
 0x4ef   : > { %v1551_v45 = vpop.permute.xlu0 %1550  ;;  %2628 = vmatprep.subr.mxu0 %v2898_v4  ;;  %2661 = vmatprep.subr.mxu1 %v2892_v2 }
 0x4f0   : > { %2624 = vmatmul.mubr.msk.f32.vlgmr.msra.gmra.mxu1 %vm786_vm8, %v1551_v45  ;;  %2629 = vmatpush3.msra.mxu0 %v2898_v4 }
 0x4f1   : > { %2662 = vmatpush3.msra.mxu1 %v2892_v2  ;;  %2630 = vmatprep.subr.mxu0 %v2908_v5 }
 0x4f2   : > { %2663 = vmatprep.subr.mxu1 %v2898_v4  ;;  %2631 = vmatpush3.msra.mxu0 %v2908_v5 }
 0x4f3   : > { %2664 = vmatpush3.msra.mxu1 %v2898_v4  ;;  %2632 = vmatprep.subr.mxu0 %v2922_v8 }
 0x4f4   : > { %2665 = vmatprep.subr.mxu1 %v2908_v5  ;;  %2633 = vmatpush3.msra.mxu0 %v2922_v8 }
 0x4f5   : > { %2666 = vmatpush3.msra.mxu1 %v2908_v5  ;;  %2634 = vmatprep.subr.mxu0 %v2928_v9 }
 0x4f6   : > { %2667 = vmatprep.subr.mxu1 %v2922_v8  ;;  %2635 = vmatpush3.msra.mxu0 %v2928_v9 }
 0x4f7   : > { %2668 = vmatpush3.msra.mxu1 %v2922_v8  ;;  %2636 = vmatprep.subr.mxu0 %v2935_v10 }
 0x4f8   : > { %2669 = vmatprep.subr.mxu1 %v2928_v9  ;;  %2637 = vmatpush3.msra.mxu0 %v2935_v10 }
 0x4f9   : > { %2670 = vmatpush3.msra.mxu1 %v2928_v9  ;;  %2638 = vmatprep.subr.mxu0 %v2942_v11 }
 0x4fa   : > { %2671 = vmatprep.subr.mxu1 %v2935_v10  ;;  %2639 = vmatpush3.msra.mxu0 %v2942_v11  ;;  %v1260_v9 = vpop.permute.xlu1 %1259 }
 0x4fb   : > { %2672 = vmatpush3.msra.mxu1 %v2935_v10  ;;  %2640 = vmatprep.subr.mxu0 %v2949_v12 }
 0x4fc   : > { %2673 = vmatprep.subr.mxu1 %v2942_v11  ;;  %2641 = vmatpush3.msra.mxu0 %v2949_v12  ;;  %v1265_v5 = vpop.permute.xlu0 %1264 }
 0x4fd   : > { %2674 = vmatpush3.msra.mxu1 %v2942_v11  ;;  %2642 = vmatprep.subr.mxu0 %v2956_v13 }
 0x4fe   : > { %2675 = vmatprep.subr.mxu1 %v2949_v12  ;;  %2643 = vmatpush3.msra.mxu0 %v2956_v13 }
 0x4ff   : > { %2676 = vmatpush3.msra.mxu1 %v2949_v12  ;;  %2644 = vmatprep.subr.mxu0 %v2963_v14 }
 0x500   : > { %2677 = vmatprep.subr.mxu1 %v2956_v13  ;;  %2645 = vmatpush3.msra.mxu0 %v2963_v14 }
 0x501   : > { %2678 = vmatpush3.msra.mxu1 %v2956_v13  ;;  %2646 = vmatprep.subr.mxu0 %v2970_v15 }
 0x502   : > { %2679 = vmatprep.subr.mxu1 %v2963_v14  ;;  %2647 = vmatpush3.msra.mxu0 %v2970_v15 }
 0x503   : > { %2680 = vmatpush3.msra.mxu1 %v2963_v14  ;;  %2648 = vmatprep.subr.mxu0 %v2977_v16 }
 0x504   : > { %2681 = vmatprep.subr.mxu1 %v2970_v15  ;;  %2649 = vmatpush3.msra.mxu0 %v2977_v16 }
 0x505   : > { %2682 = vmatpush3.msra.mxu1 %v2970_v15  ;;  %2650 = vmatprep.subr.mxu0 %v2984_v17 }
 0x506   : > { %2683 = vmatprep.subr.mxu1 %v2977_v16  ;;  %2651 = vmatpush3.msra.mxu0 %v2984_v17 }
 0x507   : > { %2684 = vmatpush3.msra.mxu1 %v2977_v16  ;;  %2652 = vmatprep.subr.mxu0 %v2991_v18 }
 0x508   : > { %2685 = vmatprep.subr.mxu1 %v2984_v17  ;;  %2653 = vmatpush3.msra.mxu0 %v2991_v18 }
 0x509   : > { %2686 = vmatpush3.msra.mxu1 %v2984_v17  ;;  %2654 = vmatprep.subr.mxu0 %v3054_v26 }
 0x50a   : > { %2687 = vmatprep.subr.mxu1 %v2991_v18  ;;  %2655 = vmatpush3.msra.mxu0 %v3054_v26 }
 0x50b   : > { %2688 = vmatpush3.msra.mxu1 %v2991_v18  ;;  %2656 = vmatprep.subr.mxu0 %v3062_v27 }
 0x50c   : > { %2689 = vmatprep.subr.mxu1 %v3054_v26  ;;  %2657 = vmatpush3.msra.mxu0 %v3062_v27 }
 0x50d   : > { %2690 = vmatpush3.msra.mxu1 %v3054_v26  ;;  %2696 = vmatprep.subr.mxu0 %v2779_v36 }
 0x50e   : > { %2691 = vmatprep.subr.mxu1 %v3062_v27 }
 0x50f   : > { %2692 = vmatpush3.msra.mxu1 %v3062_v27 }
 0x510   : > { %2703 = vmatprep.subr.mxu1 %v2779_v36 }
 0x5a2   : > { %v2597_v2 = vpop.f32.mrf.mxu1 }
 0x5a3   : > { %v1268_v8 = vadd.f32 %v2597_v2, %v1265_v5 }
 0x5a4   : > { %v1248_v4 = vpop.f32.mrf.mxu1 }
 0x5a5   : > { %v1267_v11 = vadd.f32 %v1260_v9, %v1248_v4 }
 0x5a7   : > { %v2604_v10 = vpop.f32.mrf.mxu0  ;;  %v2611_v13 = vpop.f32.mrf.mxu1 }
 0x5a8   : > { %v1361_v12 = vadd.f32 %v2604_v10, %v1268_v8 }
 0x5a9   : > { %v1351_v14 = vpop.f32.mrf.mxu0  ;;  %v1436_v17 = vpop.f32.mrf.mxu1 }
 0x5aa   : > { %v1360_v15 = vadd.f32 %v1351_v14, %v1267_v11  ;;  %v1446_v16 = vadd.f32 %v2611_v13, %v1361_v12 }
 0x5ac   : > { %v2618_v18 = vpop.f32.mrf.mxu0  ;;  %v1445_v26 = vadd.f32 %v1436_v17, %v1360_v15 }
 0x5ad   : > { %v1539_v48 = vadd.f32 %v2618_v18, %v1446_v16 }
 0x5ae   : > { %v1529_v47 = vpop.f32.mrf.mxu0 }
 0x5af   : > { %v1538_v49 = vadd.f32 %v1529_v47, %v1445_v26 }
 0x5b0   : > { %v2625_v27 = vpop.f32.mrf.mxu1 }
 0x5b1   : > { %v3271_v50 = vadd.f32 %v2625_v27, %v1539_v48 }
 0x5b2   : > { %v1622_v51 = vpop.f32.mrf.mxu1 }
 0x5b3   : > { %v3273_v52 = vadd.f32 %v1622_v51, %v1538_v49  ;;  %v1713_v53 = vmul.f32 %v3271_v50, %v3271_v50 }
 0x5b5   : > { %2658 = vmatprep.mubr.f32.mxu0 %v3273_v52  ;;  %v1712_v31 = vmul.f32 %v3273_v52, %v3273_v52 }
 0x5b6   : > { %2659 = vmatmul.mubr.f32.vlgmr.msra.gmra.mxu0 %v3271_v50 }
 0x5b7   : > { %2693 = vmatprep.mubr.f32.mxu1 %v1712_v31  ;;  %2700 = vmatprep.mubr.msk.f32.mxu0 %vm2780_vm7, %v2779_v36 }
 0x5b8   : > { %2694 = vmatmul.mubr.f32.vlgmr.msra.gmra.mxu1 %v1713_v53 }
 0x5b9   : > { %2707 = vmatprep.mubr.msk.f32.mxu1 %vm2780_vm7, %v2779_v36 }
 0x676   : > { %v2660_v54 = vpop.f32.mrf.mxu0 }
 0x677   : > { %2697 = vmatpush3.msra.mxu0 %v2660_v54 }
 0x678   : > { %v1703_v55 = vpop.f32.mrf.mxu0  ;;  %v2695_v33 = vpop.f32.mrf.mxu1  ;;  %2698 = vmatprep.subr.mxu0 %v2779_v36 }
 0x679   : > { %2699 = vmatpush3.msra.mxu0 %v1703_v55  ;;  %2704 = vmatpush3.msra.mxu1 %v2695_v33 }
 0x67a   : > { %v1780_v56 = vpop.f32.mrf.mxu1  ;;  %2701 = vmatmul.mubr.msk.f32.vlgmr.msra.gmra.mxu0 %vm786_vm8, %v3085_v38  ;;  %2705 = vmatprep.subr.mxu1 %v2779_v36  ;;  %v2148_v36 = vld [vmem:[%s3349_s9] sm:$0xff] }
 0x67b   : > { %2706 = vmatpush3.msra.mxu1 %v1780_v56  ;;  %2712 = vmatprep.mubr.msk.f32.mxu0 %vm937_vm9, %v3099_v42 }
 0x67c   : > { %2708 = vmatmul.mubr.msk.f32.vlgmr.msra.gmra.mxu1 %vm786_vm8, %v3085_v38  ;;  %v2149_v38 = vld [vmem:[%s3349_s9 + $0x8] sm:$0xff] }
 0x67d   : > { %2717 = vmatprep.mubr.msk.f32.mxu1 %vm937_vm9, %v3099_v42 }
 0x73a   : > { %v1855_v57 = vpop.f32.mrf.mxu0 }
 0x73b   : > { %v1929_v58 = vmul.f32 0.03125, %v1855_v57 }
 0x73c   : > { %v2702_v59 = vpop.f32.mrf.mxu0  ;;  %v1925_v60 = vpop.f32.mrf.mxu1 }
 0x73d   : > { %v1930_v61 = vmul.f32 0.03125, %v1925_v60  ;;  %v1931_v62 = vmul.f32 %v1929_v58, %v1929_v58  ;;  %2710 = vmatprep.subr.mxu0 %v1929_v58 }
 0x73e   : > { %v2709_v63 = vpop.f32.mrf.mxu1  ;;  %2711 = vmatpush3.msra.mxu0 %v1929_v58 }
 0x73f   : > { %v1932_v0 = vsub.f32 %v1930_v61, %v1931_v62  ;;  %2713 = vmatmul.mubr.msk.f32.vlgmr.msra.gmra.mxu0 %vm937_vm9, %v3108_v46  ;;  %2720 = vmatprep.subr.mxu0 %v2883_v1 }
 0x740   : > { %2721 = vmatpush3.msra.mxu0 %v2883_v1  ;;  %2722 = vmatprep.mubr.msk.f32.mxu0 %vm937_vm9, %v2148_v36  ;;  %v1634_v1 = vld [vmem:[%s3347_s7 + $0x8] sm:$0xff] }
 0x741   : > { %v1933_v42 = vmax.f32 %v1932_v0, 0.0 }
 0x743   : > { %v1934_v3 = vadd.f32 1e-05, %v1933_v42  ;;  %2723 = vmatmul.mubr.msk.f32.vlgmr.msra.gmra.mxu0 %vm937_vm9, %v2149_v38 }
 0x745   : > { %2756 = vrsqrt.f32 %v1934_v3 }
 0x752   : > { %v2757_v6 = vpop.eup %2756 }
 0x753   : > { %2715 = vmatprep.subr.mxu1 %v2757_v6 }
 0x754   : > { %2716 = vmatpush3.msra.mxu1 %v2757_v6 }
 0x755   : > { %2718 = vmatmul.mubr.msk.f32.vlgmr.msra.gmra.mxu1 %vm937_vm9, %v3108_v46  ;;  %v1635_v46 = vld [vmem:[%s3348_s8] sm:$0xff] }
 0x7ff   : > { %v2714_v19 = vpop.f32.mrf.mxu0 }
 0x801   : > { %v2002_v35 = vpop.f32.mrf.mxu0 }
 0x815   : > { %v2719_v7 = vpop.f32.mrf.mxu1 }
 0x816   : > { %v2087_v28 = vmul.f32 %v2719_v7, %v1634_v1 }
 0x817   : > { %v2077_v30 = vpop.f32.mrf.mxu1 }
 0x818   : > { %v2089_v32 = vmul.f32 %v2714_v19, %v2087_v28  ;;  %v2086_v34 = vmul.f32 %v2077_v30, %v1633_v25  ;;  %2099 = vperm.xlu0 %2744, %v2087_v28  }
 0x81a   : > { %v2091_v37 = vsub.f32 %v1636_v29, %v2089_v32  ;;  %v2088_v39 = vmul.f32 %v2086_v34, %v2002_v35  ;;  %2094 = vperm.xlu1 %2745, %v2086_v34  }
 0x81c   : > { %v2090_v20 = vsub.f32 %v1635_v46, %v2088_v39  ;;  %2111 = vperm.xlu0 %2744, %v2091_v37  }
 0x81e   : > { %2106 = vperm.xlu1 %2745, %v2090_v20  }
 0x820   : > { %2159 = vperm.xlu0 %2744, %v2151_v40  }
 0x822   : > { %2154 = vperm.xlu1 %2745, %v2150_v41  }
 0x893   : > { %v2100_v24 = vpop.permute.xlu0 %2099 }
 0x894   : > { %v2103_v21 = vmul.f32 %v3147_v23, %v2100_v24 }
 0x895   : > { %v2095_v43 = vpop.permute.xlu1 %2094 }
 0x896   : > { %v2102_v22 = vmul.f32 %v3147_v23, %v2095_v43  ;;  %v2117_v45 = vmul.f32 %v2103_v21, %v3271_v50 }
 0x897   : > { %v2112_v44 = vpop.permute.xlu0 %2111 }
 0x898   : > { %v2115_v2 = vmul.f32 %v3147_v23, %v2112_v44  ;;  %v2116_v5 = vmul.f32 %v2102_v22, %v3273_v52  ;;  %v2724_v52 = vpop.f32.mrf.mxu0 }
 0x899   : > { %v2107_v4 = vpop.permute.xlu1 %2106 }
 0x89a   : > { %v2119_v8 = vadd.f32 %v2117_v45, %v2115_v2  ;;  %v2114_v9 = vmul.f32 %v3147_v23, %v2107_v4  ;;  %v2234_v57 = vpop.f32.mrf.mxu0 }
 0x89b   : > { %v2160_v53 = vpop.permute.xlu0 %2159 }
 0x89c   : > { %v2121_v10 = vmin.f32 %v2119_v8, 20.0  ;;  %v2118_v11 = vadd.f32 %v2116_v5, %v2114_v9  ;;  %vm2141_vm12 = vcmp.gt.f32.partialorder %v2119_v8, 20.0  ;;  %v2240_v61 = vadd.f32 %v2724_v52, %v2160_v53 }
 0x89d   : > { %v2155_v60 = vpop.permute.xlu1 %2154 }
 0x89e   : > { %v2124_v12 = vmul.f32 1.442695, %v2121_v10  ;;  %v2120_v13 = vmin.f32 %v2118_v11, 20.0  ;;  %vm2140_vm13 = vcmp.gt.f32.partialorder %v2118_v11, 20.0  ;;  %v2235_v0 = vadd.f32 %v2234_v57, %v2155_v60 }
 0x8a0   : > { %2758 = vpow2.f32 %v2124_v12  ;;  %v2122_v14 = vmul.f32 1.442695, %v2120_v13 }
 0x8a2   : > { %2760 = vpow2.f32 %v2122_v14 }
 0x8ad   : > { %v2759_v15 = vpop.eup %2758 }
 0x8ae   : > { %v2127_v16 = vadd.f32 2.0, %v2759_v15 }
 0x8af   : > { %v2761_v17 = vpop.eup %2760 }
 0x8b0   : > { %v2129_v18 = vmul.f32 %v2759_v15, %v2127_v16  ;;  %v2126_v26 = vadd.f32 2.0, %v2761_v17 }
 0x8b2   : > { %v2131_v47 = vadd.f32 2.0, %v2129_v18  ;;  %v2128_v48 = vmul.f32 %v2761_v17, %v2126_v26  ;;  %v2143_v55 = vmul.f32 %v2129_v18, %v2119_v8 }
 0x8b4   : > { %2762 = vrcp.f32 %v2131_v47  ;;  %v2130_v27 = vadd.f32 2.0, %v2128_v48  ;;  %v2142_v59 = vmul.f32 %v2128_v48, %v2118_v11 }
 0x8b6   : > { %2764 = vrcp.f32 %v2130_v27 }
 0x8c1   : > { %v2763_v49 = vpop.eup %2762 }
 0x8c2   : > { %v2135_v23 = vmul.f32 %v2763_v49, %v2131_v47 }
 0x8c3   : > { %v2765_v50 = vpop.eup %2764 }
 0x8c4   : > { %v2137_v51 = vsub.f32 2.0, %v2135_v23  ;;  %v2134_v31 = vmul.f32 %v2765_v50, %v2130_v27 }
 0x8c6   : > { %v2139_v54 = vmul.f32 %v2763_v49, %v2137_v51  ;;  %v2136_v33 = vsub.f32 2.0, %v2134_v31 }
 0x8c8   : > { %v2145_v56 = vmul.f32 %v2143_v55, %v2139_v54  ;;  %v2138_v58 = vmul.f32 %v2765_v50, %v2136_v33 }
 0x8ca   : > { %v2147_v62 = vsel %vm2141_vm12, %v2119_v8, %v2145_v56  ;;  %v2144_v36 = vmul.f32 %v2142_v59, %v2138_v58 }
 0x8cb   : > { %v2244_v63 = vadd.f32 %v2240_v61, %v2147_v62 }
 0x8cc   : > { %v2146_v38 = vsel %vm2140_vm13, %v2118_v11, %v2144_v36 }
 0x8cd   : > { %2246 = vst [vmem:[%s491_s22 + $0x8] sm:$0xff] %v2244_v63  ;;  %v2243_v42 = vadd.f32 %v2235_v0, %v2146_v38 }
 0x8cf   : > { %2245 = vst [vmem:[%s491_s22] sm:$0xff] %v2243_v42 }
 0x8d0 PF: > { %s25_s18 = sadd.s32 1, %s2772_s18  }
 0x8d1   : > { %p22_p4 = scmp.ge.s32.totalorder %s25_s18, 4  }
 0x8d3   :  { %24 = sbr.rel (!%p22_p4) target bundleno = 1 (0x1), region = 110 }

// kernel: residual_conv_block.1
= control target key start
LH: loop header
LB: loop body
LE: loop exit
PB: predicated region body
PF: predicated region fallthrough
CT: control target
= control target key end

     0   :  { %s2865_s18 = smov 0   ;;  %s3340_s0 = inlined_call_operand.vmem [shape: f32[2,8,128], index: 0, kind: input, shape index: {}]   ;;  %s3341_s1 = inlined_call_operand.vmem [shape: f32[16,40], index: 1, kind: input, shape index: {}]   ;;  %s3342_s2 = inlined_call_operand.vmem [shape: f32[16,1], index: 2, kind: input, shape index: {}]   ;;  %s3343_s3 = inlined_call_operand.vmem [shape: f32[16,1], index: 3, kind: input, shape index: {}]   ;;  %s3344_s4 = inlined_call_operand.vmem [shape: f32[16,1], index: 4, kind: input, shape index: {}]   ;;  %s3345_s5 = inlined_call_operand.vmem [shape: f32[16,80], index: 5, kind: input, shape index: {}]   ;;  %s3346_s6 = inlined_call_operand.vmem [shape: f32[16,1], index: 6, kind: input, shape index: {}]   ;;  %s3347_s7 = inlined_call_operand.vmem [shape: f32[16,1], index: 7, kind: input, shape index: {}]   ;;  %s3348_s8 = inlined_call_operand.vmem [shape: f32[16,1], index: 8, kind: input, shape index: {}]   ;;  %s3349_s9 = inlined_call_operand.vmem [shape: f32[16,8], index: 9, kind: input, shape index: {}]   ;;  %s3350_s10 = inlined_call_operand.vmem [shape: f32[16,1], index: 10, kind: input, shape index: {}]   ;;  %s3351_s11 = inlined_call_operand.vmem [shape: f32[8,16], index: 11, kind: input, shape index: {}]   ;;  %s3352_s12 = inlined_call_operand.vmem [shape: f32[16,8], index: 12, kind: input, shape index: {}]   ;;  %s3353_s13 = inlined_call_operand.vmem [shape: f32[128,1], index: 13, kind: input, shape index: {}]   ;;  %s3354_s14 = inlined_call_operand.vmem [shape: f32[1,128], index: 14, kind: input, shape index: {}]   ;;  %s3355_s15 = inlined_call_operand.vmem [shape: f32[2,16,128], index: 15, kind: output, shape index: {}]  }
   0x1 LB: > { %s2302_s19 = sadd.s32 4294967295, %s2772_s18   ;;  %p2306_p0 = scmp.ge.s32.totalorder %s2772_s18, 1  ;;  %s2772_s18 = sphi %s2865_s18, %s25_s18  }
   0x2   : > { %p436_p1 = scmp.lt.s32.totalorder %s2772_s18, 3 }
   0x4   : > { %p437_p2 = pnand %p2306_p0, %p436_p1 }
   0x5   : > { %p483_p3 = scmp.lt.s32.totalorder (!%p437_p2), %s2302_s19, 1  ;;  %s2774_s26 = smov (!%p437_p2), 126  }
   0x6   : > { %440 = sbr.rel (%p437_p2) target bundleno = 2256 (0x8d0), region = 80  ;;  %s2775_s27 = smov (!%p437_p2), 1  }
   0x7   : > { %s2777_s17 = smov (!%p437_p2), 127   ;;  %s2781_s28 = smov (!%p437_p2), 112  }
   0x8   : > { %s2782_s16 = smov (!%p437_p2), 96   ;;  %s2783_s21 = smov (!%p437_p2), 80  }
   0x9   : > { %s2784_s24 = smov (!%p437_p2), 64  }
   0xb   : > { %s3361_s19 = smov (!%p483_p3, %s2302_s19), 1  ;;  %v534_v0 = vld [vmem:[%s3341_s1] sm:$0xff]  ;;  %vm548_vm0 = vcmask 326656   ;;  %v2892_v2 = vld [vmem:[%s3353_s13 + $0x78] sm:$0xff]  ;;  %v2776_v3 = vmov 0   ;;  %v2898_v4 = vld [vmem:[%s3353_s13 + $0x70] sm:$0xff] }
   0xc   : > { %s2307_s20 = sshll.u32 %s3361_s19, 3  ;;  %2494 = vmatprep.mubr.msk.f32.mxu0 %vm548_vm0, %v534_v0  ;;  %2745 = vset.pattern.permute.xlu1 %v2776_v3  ;;  %v2908_v5 = vld [vmem:[%s3353_s13 + $0x68] sm:$0xff]  ;;  %v536_v7 = vld [vmem:[%s3342_s2] sm:$0xff]  ;;  %v2928_v9 = vld [vmem:[%s3353_s13 + $0x58] sm:$0xff]  ;;  %vm532_vm1 = vcmask 1031168   ;;  %vm527_vm2 = vcmask 1039360  }
   0xd   : > { %s486_s25 = scalar_lea.vmem %s3340_s0, %s2307_s20  ;;  %2744 = vset.pattern.permute.xlu0 %v2776_v3  ;;  %2497 = vmatprep.subr.mxu1 %v2892_v2  ;;  %s2778_s20 = smov 2   ;;  %v537_v6 = vld [vmem:[%s3342_s2 + $0x8] sm:$0xff]  ;;  %v2922_v8 = vld [vmem:[%s3353_s13 + $0x60] sm:$0xff]  ;;  %v2935_v10 = vld [vmem:[%s3353_s13 + $0x50] sm:$0xff]  ;;  %vm522_vm3 = vcmask 7168   ;;  %vm517_vm4 = vcmask 15360  }
   0xe   : > { %v2883_v1 = vld [vmem:[%s486_s25] sm:$0xff]  ;;  %2498 = vmatpush3.msra.mxu1 %v2892_v2  ;;  %v2942_v11 = vld [vmem:[%s3353_s13 + $0x48] sm:$0xff]  ;;  %v2956_v13 = vld [vmem:[%s3353_s13 + $0x38] sm:$0xff]  ;;  %v2779_v36 = vmov 0.0   ;;  %vm2780_vm7 = vmmov 0   ;;  %vm786_vm8 = vcmask 130048  }
   0xf   : > { %529 = vrot.lane.b32.xlu0 %v2883_v1, %s2774_s26  ;;  %519 = vrot.lane.b32.xlu1 %v2883_v1, %s2775_s27  ;;  %v2949_v12 = vld [vmem:[%s3353_s13 + $0x40] sm:$0xff]  ;;  %v2963_v14 = vld [vmem:[%s3353_s13 + $0x30] sm:$0xff]  ;;  %vm3001_vm5 = vmneg %vm522_vm3  ;;  %vm937_vm9 = vcmask 64512   ;;  %s2357_s30 = sshll.u32 %s3361_s19, 4 }
  0x10   : > { %2499 = vmatprep.subr.mxu1 %v2898_v4  ;;  %v2970_v15 = vld [vmem:[%s3353_s13 + $0x28] sm:$0xff]  ;;  %v2977_v16 = vld [vmem:[%s3353_s13 + $0x20] sm:$0xff]  ;;  %v2984_v17 = vld [vmem:[%s3353_s13 + $0x18] sm:$0xff]  ;;  %s491_s22 = scalar_lea.vmem %s3355_s15, %s2357_s30 }
  0x11   : > { %2500 = vmatpush3.msra.mxu1 %v2898_v4  ;;  %v2991_v18 = vld [vmem:[%s3353_s13 + $0x10] sm:$0xff]  ;;  %vm3007_vm6 = vmneg %vm517_vm4  ;;  %v535_v25 = vld [vmem:[%s3341_s1 + $0x8] sm:$0xff] }
  0x12   : > { %2501 = vmatprep.subr.mxu1 %v2908_v5  ;;  %v3054_v26 = vld [vmem:[%s3353_s13 + $0x8] sm:$0xff]  ;;  %v3062_v27 = vld [vmem:[%s3353_s13] sm:$0xff] }
  0x13   : > { %524 = vrot.lane.b32.xlu0 %v2883_v1, %s2777_s17  ;;  %514 = vrot.lane.b32.xlu1 %v2883_v1, %s2778_s20  ;;  %v3085_v38 = vld [vmem:[%s3351_s11] sm:$0xff]  ;;  %v3108_v46 = vld [vmem:[%s3352_s12 + $0x8] sm:$0xff] }
  0x14   : > { %2502 = vmatpush3.msra.mxu1 %v2908_v5  ;;  %v3099_v42 = vld [vmem:[%s3352_s12] sm:$0xff]  ;;  %v631_v55 = vld [vmem:[%s3343_s3 + $0x8] sm:$0xff] }
  0x15   : > { %2503 = vmatprep.subr.mxu1 %v2922_v8  ;;  %v630_v58 = vld [vmem:[%s3343_s3] sm:$0xff]  ;;  %v633_v61 = vld [vmem:[%s3344_s4 + $0x8] sm:$0xff] }
  0x16   : > { %2504 = vmatpush3.msra.mxu1 %v2922_v8  ;;  %v632_v3 = vld [vmem:[%s3344_s4] sm:$0xff] }
  0x17   : > { %545 = vperm.xlu1 %2745, %v537_v6   ;;  %540 = vperm.xlu0 %2744, %v536_v7  }
  0x18   : > { %2505 = vmatprep.subr.mxu1 %v2928_v9 }
  0x19   : > { %2506 = vmatpush3.msra.mxu1 %v2928_v9 }
  0x1a   : > { %2507 = vmatprep.subr.mxu1 %v2935_v10 }
  0x1b   : > { %2508 = vmatpush3.msra.mxu1 %v2935_v10 }
  0x1c   : > { %2509 = vmatprep.subr.mxu1 %v2942_v11 }
  0x1d   : > { %2510 = vmatpush3.msra.mxu1 %v2942_v11 }
  0x1e   : > { %2511 = vmatprep.subr.mxu1 %v2949_v12 }
  0x1f   : > { %2512 = vmatpush3.msra.mxu1 %v2949_v12 }
  0x20   : > { %2513 = vmatprep.subr.mxu1 %v2956_v13 }
  0x21   : > { %2514 = vmatpush3.msra.mxu1 %v2956_v13 }
  0x22   : > { %2515 = vmatprep.subr.mxu1 %v2963_v14 }
  0x23   : > { %2516 = vmatpush3.msra.mxu1 %v2963_v14 }
  0x24   : > { %2517 = vmatprep.subr.mxu1 %v2970_v15 }
  0x25   : > { %2518 = vmatpush3.msra.mxu1 %v2970_v15 }
  0x26   : > { %2519 = vmatprep.subr.mxu1 %v2977_v16 }
  0x27   : > { %2520 = vmatpush3.msra.mxu1 %v2977_v16 }
  0x28   : > { %2521 = vmatprep.subr.mxu1 %v2984_v17 }
  0x29   : > { %2522 = vmatpush3.msra.mxu1 %v2984_v17 }
  0x2a   : > { %2523 = vmatprep.subr.mxu1 %v2991_v18 }
  0x2b   : > { %2524 = vmatpush3.msra.mxu1 %v2991_v18 }
  0x2c   : > { %2525 = vmatprep.subr.mxu1 %v3054_v26 }
  0x2d   : > { %2526 = vmatpush3.msra.mxu1 %v3054_v26 }
  0x2e   : > { %2527 = vmatprep.subr.mxu1 %v3062_v27 }
  0x2f   : > { %2528 = vmatpush3.msra.mxu1 %v3062_v27 }
  0x30   : > { %2567 = vmatprep.subr.mxu1 %v2779_v36 }
  0x81   : > { %v530_v19 = vpop.permute.xlu0 %529  ;;  %v520_v20 = vpop.permute.xlu1 %519 }
  0x82   : > { %2484 = vmatprep.subr.msk.mxu0 %vm532_vm1, %v530_v19 }
  0x83   : > { %2485 = vmatpush3.msk.msra.mxu0 %vm532_vm1, %v530_v19 }
  0x85   : > { %v525_v21 = vpop.permute.xlu0 %524  ;;  %v515_v23 = vpop.permute.xlu1 %514 }
  0x86   : > { %2486 = vmatprep.subr.msk.mxu0 %vm527_vm2, %v525_v21 }
  0x87   : > { %2487 = vmatpush3.msk.msra.mxu0 %vm527_vm2, %v525_v21  ;;  %v3137_v21 = vld [vmem:[%s3345_s5 + $0x8] sm:$0xff] }
  0x88   : > { %2488 = vmatprep.subr.mxu0 %v2883_v1 }
  0x89   : > { %2489 = vmatpush3.msra.mxu0 %v2883_v1 }
  0x8a   : > { %2490 = vmatprep.subr.msk.mxu0 %vm3001_vm5, %v520_v20 }
  0x8b   : > { %2491 = vmatpush3.msk.msra.mxu0 %vm3001_vm5, %v520_v20  ;;  %v3129_v20 = vld [vmem:[%s3345_s5] sm:$0xff] }
  0x8c   : > { %2492 = vmatprep.subr.msk.mxu0 %vm3007_vm6, %v515_v23 }
  0x8d   : > { %2493 = vmatpush3.msk.msra.mxu0 %vm3007_vm6, %v515_v23  ;;  %v3147_v23 = vld [vmem:[%s3354_s14] ss:$0 sm:$0xff] }
  0x8e   : > { %2495 = vmatmul.mubr.msk.f32.vlgmr.msra.gmra.mxu0 %vm548_vm0, %v535_v25  ;;  %2532 = vmatprep.subr.mxu0 %v2892_v2 }
  0x8f   : > { %2533 = vmatpush3.msra.mxu0 %v2892_v2 }
  0x90   : > { %2534 = vmatprep.subr.mxu0 %v2898_v4 }
  0x91   : > { %2535 = vmatpush3.msra.mxu0 %v2898_v4 }
  0x92   : > { %2536 = vmatprep.subr.mxu0 %v2908_v5  ;;  %v546_v28 = vpop.permute.xlu1 %545  ;;  %v541_v30 = vpop.permute.xlu0 %540 }
  0x93   : > { %2537 = vmatpush3.msra.mxu0 %v2908_v5 }
  0x94   : > { %2538 = vmatprep.subr.mxu0 %v2922_v8 }
  0x95   : > { %2539 = vmatpush3.msra.mxu0 %v2922_v8 }
  0x96   : > { %2540 = vmatprep.subr.mxu0 %v2928_v9 }
  0x97   : > { %2541 = vmatpush3.msra.mxu0 %v2928_v9 }
  0x98   : > { %2542 = vmatprep.subr.mxu0 %v2935_v10 }
  0x99   : > { %2543 = vmatpush3.msra.mxu0 %v2935_v10 }
  0x9a   : > { %2544 = vmatprep.subr.mxu0 %v2942_v11 }
  0x9b   : > { %2545 = vmatpush3.msra.mxu0 %v2942_v11 }
  0x9c   : > { %2546 = vmatprep.subr.mxu0 %v2949_v12 }
  0x9d   : > { %2547 = vmatpush3.msra.mxu0 %v2949_v12 }
  0x9e   : > { %2548 = vmatprep.subr.mxu0 %v2956_v13 }
  0x9f   : > { %2549 = vmatpush3.msra.mxu0 %v2956_v13 }
  0xa0   : > { %2550 = vmatprep.subr.mxu0 %v2963_v14 }
  0xa1   : > { %2551 = vmatpush3.msra.mxu0 %v2963_v14 }
  0xa2   : > { %2552 = vmatprep.subr.mxu0 %v2970_v15 }
  0xa3   : > { %2553 = vmatpush3.msra.mxu0 %v2970_v15 }
  0xa4   : > { %2554 = vmatprep.subr.mxu0 %v2977_v16 }
  0xa5   : > { %2555 = vmatpush3.msra.mxu0 %v2977_v16 }
  0xa6   : > { %2556 = vmatprep.subr.mxu0 %v2984_v17 }
  0xa7   : > { %2557 = vmatpush3.msra.mxu0 %v2984_v17 }
  0xa8   : > { %2558 = vmatprep.subr.mxu0 %v2991_v18 }
  0xa9   : > { %2559 = vmatpush3.msra.mxu0 %v2991_v18 }
  0xaa   : > { %2560 = vmatprep.subr.mxu0 %v3054_v26 }
  0xab   : > { %2561 = vmatpush3.msra.mxu0 %v3054_v26 }
  0xac   : > { %2562 = vmatprep.subr.mxu0 %v3062_v27 }
  0xad   : > { %2563 = vmatpush3.msra.mxu0 %v3062_v27 }
 0x14e   : > { %v2496_v29 = vpop.f32.mrf.mxu0 }
 0x14f   : > { %v3069_v31 = vadd.f32 %v2496_v29, %v546_v28 }
 0x150   : > { %v621_v32 = vpop.f32.mrf.mxu0 }
 0x151   : > { %v3071_v33 = vadd.f32 %v621_v32, %v541_v30  ;;  %v710_v35 = vmul.f32 %v3069_v31, %v3069_v31 }
 0x153   : > { %2529 = vmatprep.mubr.f32.mxu1 %v3071_v33  ;;  %v709_v34 = vmul.f32 %v3071_v33, %v3071_v33 }
 0x154   : > { %2530 = vmatmul.mubr.f32.vlgmr.msra.gmra.mxu1 %v3069_v31 }
 0x155   : > { %2564 = vmatprep.mubr.f32.mxu0 %v709_v34  ;;  %2571 = vmatprep.mubr.msk.f32.mxu1 %vm2780_vm7, %v2779_v36 }
 0x156   : > { %2565 = vmatmul.mubr.f32.vlgmr.msra.gmra.mxu0 %v710_v35 }
 0x157   : > { %2588 = vmatprep.mubr.msk.f32.mxu0 %vm937_vm9, %v3099_v42 }
 0x214   : > { %v2531_v37 = vpop.f32.mrf.mxu1 }
 0x215   : > { %2568 = vmatpush3.msra.mxu1 %v2531_v37 }
 0x216   : > { %v700_v39 = vpop.f32.mrf.mxu1  ;;  %v2566_v40 = vpop.f32.mrf.mxu0  ;;  %2569 = vmatprep.subr.mxu1 %v2779_v36 }
 0x217   : > { %2570 = vmatpush3.msra.mxu1 %v700_v39 }
 0x218   : > { %2572 = vmatmul.mubr.msk.f32.vlgmr.msra.gmra.mxu1 %vm786_vm8, %v3085_v38  ;;  %2574 = vmatprep.subr.mxu1 %v2779_v36  ;;  %v777_v41 = vpop.f32.mrf.mxu0 }
 0x219   : > { %2575 = vmatpush3.msra.mxu1 %v2566_v40  ;;  %2578 = vmatprep.mubr.msk.f32.mxu1 %vm2780_vm7, %v2779_v36 }
 0x21a   : > { %2576 = vmatprep.subr.mxu1 %v2779_v36 }
 0x21b   : > { %2577 = vmatpush3.msra.mxu1 %v777_v41 }
 0x21c   : > { %2579 = vmatmul.mubr.msk.f32.vlgmr.msra.gmra.mxu1 %vm786_vm8, %v3085_v38 }
 0x21d   : > { %2583 = vmatprep.mubr.msk.f32.mxu1 %vm937_vm9, %v3099_v42 }
 0x2d8   : > { %v856_v43 = vpop.f32.mrf.mxu1 }
 0x2d9   : > { %v930_v44 = vmul.f32 0.03125, %v856_v43 }
 0x2da   : > { %v2573_v45 = vpop.f32.mrf.mxu1 }
 0x2db   : > { %2581 = vmatprep.subr.mxu1 %v930_v44  ;;  %v932_v49 = vmul.f32 %v930_v44, %v930_v44 }
 0x2dc   : > { %v926_v47 = vpop.f32.mrf.mxu1  ;;  %2582 = vmatpush3.msra.mxu1 %v930_v44 }
 0x2dd   : > { %v931_v48 = vmul.f32 0.03125, %v926_v47  ;;  %2584 = vmatmul.mubr.msk.f32.vlgmr.msra.gmra.mxu1 %vm937_vm9, %v3108_v46 }
 0x2de   : > { %v2580_v50 = vpop.f32.mrf.mxu1  ;;  %2595 = vmatprep.mubr.msk.f32.mxu1 %vm786_vm8, %v3129_v20 }
 0x2df   : > { %v933_v51 = vsub.f32 %v931_v48, %v932_v49 }
 0x2e1   : > { %v934_v52 = vmax.f32 %v933_v51, 0.0 }
 0x2e3   : > { %v935_v53 = vadd.f32 1e-05, %v934_v52 }
 0x2e5   : > { %2746 = vrsqrt.f32 %v935_v53 }
 0x2f2   : > { %v2747_v54 = vpop.eup %2746 }
 0x2f3   : > { %2586 = vmatprep.subr.mxu0 %v2747_v54 }
 0x2f4   : > { %2587 = vmatpush3.msra.mxu0 %v2747_v54 }
 0x2f5   : > { %2589 = vmatmul.mubr.msk.f32.vlgmr.msra.gmra.mxu0 %vm937_vm9, %v3108_v46 }
 0x39d   : > { %v2585_v56 = vpop.f32.mrf.mxu1 }
 0x39f   : > { %v1010_v0 = vpop.f32.mrf.mxu1 }
 0x3b5   : > { %v2590_v57 = vpop.f32.mrf.mxu0 }
 0x3b6   : > { %v1095_v59 = vmul.f32 %v2590_v57, %v631_v55 }
 0x3b7   : > { %v1085_v60 = vpop.f32.mrf.mxu0 }
 0x3b8   : > { %v1097_v62 = vmul.f32 %v2585_v56, %v1095_v59  ;;  %v1094_v63 = vmul.f32 %v1085_v60, %v630_v58  ;;  %1107 = vperm.xlu1 %2745, %v1095_v59  }
 0x3ba   : > { %v1096_v6 = vmul.f32 %v1094_v63, %v1010_v0  ;;  %1102 = vperm.xlu0 %2744, %v1094_v63   ;;  %v1099_v7 = vsub.f32 %v633_v61, %v1097_v62 }
 0x3bc   : > { %1125 = vperm.xlu1 %2745, %v1099_v7   ;;  %v1098_v19 = vsub.f32 %v632_v3, %v1096_v6 }
 0x3be   : > { %1120 = vperm.xlu0 %2744, %v1098_v19  }
 0x3c0   : > { %1277 = vrot.lane.b32.xlu1 %v3129_v20, %s2781_s28 }
 0x3c2   : > { %1279 = vrot.lane.b32.xlu0 %v3137_v21, %s2781_s28 }
 0x3c4   : > { %1364 = vrot.lane.b32.xlu1 %v3137_v21, %s2782_s16 }
 0x3c6   : > { %1362 = vrot.lane.b32.xlu0 %v3129_v20, %s2782_s16 }
 0x3c8   : > { %1457 = vrot.lane.b32.xlu1 %v3137_v21, %s2783_s21 }
 0x3ca   : > { %1455 = vrot.lane.b32.xlu0 %v3129_v20, %s2783_s21 }
 0x433   : > { %v1108_v25 = vpop.permute.xlu1 %1107 }
 0x434   : > { %v1117_v28 = vmul.f32 %v3147_v23, %v1108_v25 }
 0x435   : > { %v1103_v29 = vpop.permute.xlu0 %1102 }
 0x436   : > { %v1116_v30 = vmul.f32 %v3147_v23, %v1103_v29  ;;  %v1131_v34 = vmul.f32 %v1117_v28, %v3069_v31  ;;  %v1162_v28 = vld [vmem:[%s3346_s6] sm:$0xff]  ;;  %v1163_v29 = vld [vmem:[%s3346_s6 + $0x8] sm:$0xff] }
 0x437   : > { %v1126_v32 = vpop.permute.xlu1 %1125 }
 0x438   : > { %v1129_v35 = vmul.f32 %v3147_v23, %v1126_v32  ;;  %v1130_v39 = vmul.f32 %v1116_v30, %v3071_v33 }
 0x439   : > { %v1121_v37 = vpop.permute.xlu0 %1120 }
 0x43a   : > { %v1133_v40 = vadd.f32 %v1131_v34, %v1129_v35  ;;  %v1128_v41 = vmul.f32 %v3147_v23, %v1121_v37 }
 0x43b   : > { %v1278_v53 = vpop.permute.xlu1 %1277 }
 0x43c   : > { %v1135_v43 = vmin.f32 %v1133_v40, 20.0  ;;  %v1132_v44 = vadd.f32 %v1130_v39, %v1128_v41  ;;  %2602 = vmatprep.mubr.msk.f32.mxu0 %vm786_vm8, %v1278_v53  ;;  %vm1155_vm10 = vcmp.gt.f32.partialorder %v1133_v40, 20.0 }
 0x43d   : > { %v1280_v30 = vpop.permute.xlu0 %1279 }
 0x43e   : > { %v1138_v45 = vmul.f32 1.442695, %v1135_v43  ;;  %v1134_v47 = vmin.f32 %v1132_v44, 20.0  ;;  %vm1154_vm11 = vcmp.gt.f32.partialorder %v1132_v44, 20.0 }
 0x43f   : > { %v1365_v32 = vpop.permute.xlu1 %1364 }
 0x440   : > { %2748 = vpow2.f32 %v1138_v45  ;;  %v1136_v48 = vmul.f32 1.442695, %v1134_v47 }
 0x441   : > { %v1363_v34 = vpop.permute.xlu0 %1362 }
 0x442   : > { %2750 = vpow2.f32 %v1136_v48 }
 0x443   : > { %v1458_v35 = vpop.permute.xlu1 %1457 }
 0x445   : > { %v1456_v37 = vpop.permute.xlu0 %1455 }
 0x44d   : > { %v2749_v49 = vpop.eup %2748 }
 0x44e   : > { %v1141_v50 = vadd.f32 2.0, %v2749_v49 }
 0x44f   : > { %v2751_v51 = vpop.eup %2750 }
 0x450   : > { %v1143_v52 = vmul.f32 %v2749_v49, %v1141_v50  ;;  %v1140_v31 = vadd.f32 2.0, %v2751_v51 }
 0x452   : > { %v1145_v54 = vadd.f32 2.0, %v1143_v52  ;;  %v1142_v55 = vmul.f32 %v2751_v51, %v1140_v31  ;;  %v1157_v62 = vmul.f32 %v1143_v52, %v1133_v40 }
 0x454   : > { %2752 = vrcp.f32 %v1145_v54  ;;  %v1144_v33 = vadd.f32 2.0, %v1142_v55  ;;  %v1156_v6 = vmul.f32 %v1142_v55, %v1132_v44 }
 0x456   : > { %2754 = vrcp.f32 %v1144_v33 }
 0x461   : > { %v2753_v56 = vpop.eup %2752 }
 0x462   : > { %v1149_v57 = vmul.f32 %v2753_v56, %v1145_v54 }
 0x463   : > { %v2755_v58 = vpop.eup %2754 }
 0x464   : > { %v1151_v59 = vsub.f32 2.0, %v1149_v57  ;;  %v1148_v60 = vmul.f32 %v2755_v58, %v1144_v33 }
 0x466   : > { %v1153_v61 = vmul.f32 %v2753_v56, %v1151_v59  ;;  %v1150_v63 = vsub.f32 2.0, %v1148_v60 }
 0x468   : > { %v1159_v0 = vmul.f32 %v1157_v62, %v1153_v61  ;;  %v1152_v3 = vmul.f32 %v2755_v58, %v1150_v63 }
 0x46a   : > { %v1158_v7 = vmul.f32 %v1156_v6, %v1152_v3  ;;  %v1161_v19 = vsel %vm1155_vm10, %v1133_v40, %v1159_v0 }
 0x46b   : > { %1170 = vrot.lane.b32.xlu1 %v1161_v19, %s2778_s20 }
 0x46c   : > { %v1160_v25 = vsel %vm1154_vm11, %v1132_v44, %v1158_v7 }
 0x46d   : > { %1168 = vrot.lane.b32.xlu0 %v1160_v25, %s2778_s20 }
 0x46f   : > { %1271 = vrot.lane.b32.xlu1 %v1161_v19, %s2775_s27 }
 0x471   : > { %1269 = vrot.lane.b32.xlu0 %v1160_v25, %s2775_s27 }
 0x473   : > { %1449 = vrot.lane.b32.xlu1 %v1161_v19, %s2777_s17 }
 0x475   : > { %1447 = vrot.lane.b32.xlu0 %v1160_v25, %s2777_s17 }
 0x477   : > { %1542 = vrot.lane.b32.xlu1 %v1161_v19, %s2774_s26 }
 0x479   : > { %1540 = vrot.lane.b32.xlu0 %v1160_v25, %s2774_s26 }
 0x47b   : > { %1548 = vrot.lane.b32.xlu1 %v3129_v20, %s2784_s24 }
 0x47d   : > { %1550 = vrot.lane.b32.xlu0 %v3137_v21, %s2784_s24 }
 0x47f   : > { %1259 = vperm.xlu1 %2745, %v1162_v28  }
 0x481   : > { %1264 = vperm.xlu0 %2744, %v1163_v29   ;;  %v1636_v29 = vld [vmem:[%s3348_s8 + $0x8] sm:$0xff] }
 0x4dd   : > { %v1171_v39 = vpop.permute.xlu1 %1170 }
 0x4de   : > { %2591 = vmatprep.subr.msk.mxu1 %vm3007_vm6, %v1171_v39 }
 0x4df   : > { %2592 = vmatpush3.msk.msra.mxu1 %vm3007_vm6, %v1171_v39  ;;  %v1169_v20 = vpop.permute.xlu0 %1168 }
 0x4e0   : > { %2593 = vmatprep.subr.msk.mxu1 %vm3007_vm6, %v1169_v20 }
 0x4e1   : > { %v1272_v40 = vpop.permute.xlu1 %1271  ;;  %2594 = vmatpush3.msk.msra.mxu1 %vm3007_vm6, %v1169_v20 }
 0x4e2   : > { %2596 = vmatmul.mubr.msk.f32.vlgmr.msra.gmra.mxu1 %vm786_vm8, %v3137_v21  ;;  %2598 = vmatprep.subr.msk.mxu0 %vm3001_vm5, %v1272_v40 }
 0x4e3   : > { %2605 = vmatprep.subr.mxu1 %v1161_v19  ;;  %2599 = vmatpush3.msk.msra.mxu0 %vm3001_vm5, %v1272_v40  ;;  %v1270_v41 = vpop.permute.xlu0 %1269  ;;  %v2151_v40 = vld [vmem:[%s3350_s10 + $0x8] sm:$0xff] }
 0x4e4   : > { %2606 = vmatpush3.msra.mxu1 %v1161_v19  ;;  %2609 = vmatprep.mubr.msk.f32.mxu1 %vm786_vm8, %v1363_v34 }
 0x4e5   : > { %2600 = vmatprep.subr.msk.mxu0 %vm3001_vm5, %v1270_v41  ;;  %2607 = vmatprep.subr.mxu1 %v1160_v25  ;;  %v1450_v24 = vpop.permute.xlu1 %1449 }
 0x4e6   : > { %2601 = vmatpush3.msk.msra.mxu0 %vm3001_vm5, %v1270_v41  ;;  %2608 = vmatpush3.msra.mxu1 %v1160_v25  ;;  %v1633_v25 = vld [vmem:[%s3347_s7] sm:$0xff] }
 0x4e7   : > { %2603 = vmatmul.mubr.msk.f32.vlgmr.msra.gmra.mxu0 %vm786_vm8, %v1280_v30  ;;  %2610 = vmatmul.mubr.msk.f32.vlgmr.msra.gmra.mxu1 %vm786_vm8, %v1365_v32  ;;  %v1448_v21 = vpop.permute.xlu0 %1447  ;;  %v2150_v41 = vld [vmem:[%s3350_s10] sm:$0xff] }
 0x4e8   : > { %2612 = vmatprep.subr.msk.mxu0 %vm527_vm2, %v1450_v24  ;;  %2616 = vmatprep.mubr.msk.f32.mxu0 %vm786_vm8, %v1456_v37 }
 0x4e9   : > { %2613 = vmatpush3.msk.msra.mxu0 %vm527_vm2, %v1450_v24  ;;  %v1543_v43 = vpop.permute.xlu1 %1542 }
 0x4ea   : > { %2614 = vmatprep.subr.msk.mxu0 %vm527_vm2, %v1448_v21  ;;  %2619 = vmatprep.subr.msk.mxu1 %vm532_vm1, %v1543_v43 }
 0x4eb   : > { %2615 = vmatpush3.msk.msra.mxu0 %vm527_vm2, %v1448_v21  ;;  %2620 = vmatpush3.msk.msra.mxu1 %vm532_vm1, %v1543_v43  ;;  %v1541_v22 = vpop.permute.xlu0 %1540 }
 0x4ec   : > { %2617 = vmatmul.mubr.msk.f32.vlgmr.msra.gmra.mxu0 %vm786_vm8, %v1458_v35  ;;  %2621 = vmatprep.subr.msk.mxu1 %vm532_vm1, %v1541_v22 }
 0x4ed   : > { %2622 = vmatpush3.msk.msra.mxu1 %vm532_vm1, %v1541_v22  ;;  %v1549_v44 = vpop.permute.xlu1 %1548  ;;  %2626 = vmatprep.subr.mxu0 %v2892_v2 }
 0x4ee   : > { %2623 = vmatprep.mubr.msk.f32.mxu1 %vm786_vm8, %v1549_v44  ;;  %2627 = vmatpush3.msra.mxu0 %v2892_v2 }
 0x4ef   : > { %v1551_v45 = vpop.permute.xlu0 %1550  ;;  %2628 = vmatprep.subr.mxu0 %v2898_v4  ;;  %2661 = vmatprep.subr.mxu1 %v2892_v2 }
 0x4f0   : > { %2624 = vmatmul.mubr.msk.f32.vlgmr.msra.gmra.mxu1 %vm786_vm8, %v1551_v45  ;;  %2629 = vmatpush3.msra.mxu0 %v2898_v4 }
 0x4f1   : > { %2662 = vmatpush3.msra.mxu1 %v2892_v2  ;;  %2630 = vmatprep.subr.mxu0 %v2908_v5 }
 0x4f2   : > { %2663 = vmatprep.subr.mxu1 %v2898_v4  ;;  %2631 = vmatpush3.msra.mxu0 %v2908_v5 }
 0x4f3   : > { %2664 = vmatpush3.msra.mxu1 %v2898_v4  ;;  %2632 = vmatprep.subr.mxu0 %v2922_v8 }
 0x4f4   : > { %2665 = vmatprep.subr.mxu1 %v2908_v5  ;;  %2633 = vmatpush3.msra.mxu0 %v2922_v8 }
 0x4f5   : > { %2666 = vmatpush3.msra.mxu1 %v2908_v5  ;;  %2634 = vmatprep.subr.mxu0 %v2928_v9 }
 0x4f6   : > { %2667 = vmatprep.subr.mxu1 %v2922_v8  ;;  %2635 = vmatpush3.msra.mxu0 %v2928_v9 }
 0x4f7   : > { %2668 = vmatpush3.msra.mxu1 %v2922_v8  ;;  %2636 = vmatprep.subr.mxu0 %v2935_v10 }
 0x4f8   : > { %2669 = vmatprep.subr.mxu1 %v2928_v9  ;;  %2637 = vmatpush3.msra.mxu0 %v2935_v10 }
 0x4f9   : > { %2670 = vmatpush3.msra.mxu1 %v2928_v9  ;;  %2638 = vmatprep.subr.mxu0 %v2942_v11 }
 0x4fa   : > { %2671 = vmatprep.subr.mxu1 %v2935_v10  ;;  %2639 = vmatpush3.msra.mxu0 %v2942_v11  ;;  %v1260_v9 = vpop.permute.xlu1 %1259 }
 0x4fb   : > { %2672 = vmatpush3.msra.mxu1 %v2935_v10  ;;  %2640 = vmatprep.subr.mxu0 %v2949_v12 }
 0x4fc   : > { %2673 = vmatprep.subr.mxu1 %v2942_v11  ;;  %2641 = vmatpush3.msra.mxu0 %v2949_v12  ;;  %v1265_v5 = vpop.permute.xlu0 %1264 }
 0x4fd   : > { %2674 = vmatpush3.msra.mxu1 %v2942_v11  ;;  %2642 = vmatprep.subr.mxu0 %v2956_v13 }
 0x4fe   : > { %2675 = vmatprep.subr.mxu1 %v2949_v12  ;;  %2643 = vmatpush3.msra.mxu0 %v2956_v13 }
 0x4ff   : > { %2676 = vmatpush3.msra.mxu1 %v2949_v12  ;;  %2644 = vmatprep.subr.mxu0 %v2963_v14 }
 0x500   : > { %2677 = vmatprep.subr.mxu1 %v2956_v13  ;;  %2645 = vmatpush3.msra.mxu0 %v2963_v14 }
 0x501   : > { %2678 = vmatpush3.msra.mxu1 %v2956_v13  ;;  %2646 = vmatprep.subr.mxu0 %v2970_v15 }
 0x502   : > { %2679 = vmatprep.subr.mxu1 %v2963_v14  ;;  %2647 = vmatpush3.msra.mxu0 %v2970_v15 }
 0x503   : > { %2680 = vmatpush3.msra.mxu1 %v2963_v14  ;;  %2648 = vmatprep.subr.mxu0 %v2977_v16 }
 0x504   : > { %2681 = vmatprep.subr.mxu1 %v2970_v15  ;;  %2649 = vmatpush3.msra.mxu0 %v2977_v16 }
 0x505   : > { %2682 = vmatpush3.msra.mxu1 %v2970_v15  ;;  %2650 = vmatprep.subr.mxu0 %v2984_v17 }
 0x506   : > { %2683 = vmatprep.subr.mxu1 %v2977_v16  ;;  %2651 = vmatpush3.msra.mxu0 %v2984_v17 }
 0x507   : > { %2684 = vmatpush3.msra.mxu1 %v2977_v16  ;;  %2652 = vmatprep.subr.mxu0 %v2991_v18 }
 0x508   : > { %2685 = vmatprep.subr.mxu1 %v2984_v17  ;;  %2653 = vmatpush3.msra.mxu0 %v2991_v18 }
 0x509   : > { %2686 = vmatpush3.msra.mxu1 %v2984_v17  ;;  %2654 = vmatprep.subr.mxu0 %v3054_v26 }
 0x50a   : > { %2687 = vmatprep.subr.mxu1 %v2991_v18  ;;  %2655 = vmatpush3.msra.mxu0 %v3054_v26 }
 0x50b   : > { %2688 = vmatpush3.msra.mxu1 %v2991_v18  ;;  %2656 = vmatprep.subr.mxu0 %v3062_v27 }
 0x50c   : > { %2689 = vmatprep.subr.mxu1 %v3054_v26  ;;  %2657 = vmatpush3.msra.mxu0 %v3062_v27 }
 0x50d   : > { %2690 = vmatpush3.msra.mxu1 %v3054_v26  ;;  %2696 = vmatprep.subr.mxu0 %v2779_v36 }
 0x50e   : > { %2691 = vmatprep.subr.mxu1 %v3062_v27 }
 0x50f   : > { %2692 = vmatpush3.msra.mxu1 %v3062_v27 }
 0x510   : > { %2703 = vmatprep.subr.mxu1 %v2779_v36 }
 0x5a2   : > { %v2597_v2 = vpop.f32.mrf.mxu1 }
 0x5a3   : > { %v1268_v8 = vadd.f32 %v2597_v2, %v1265_v5 }
 0x5a4   : > { %v1248_v4 = vpop.f32.mrf.mxu1 }
 0x5a5   : > { %v1267_v11 = vadd.f32 %v1260_v9, %v1248_v4 }
 0x5a7   : > { %v2604_v10 = vpop.f32.mrf.mxu0  ;;  %v2611_v13 = vpop.f32.mrf.mxu1 }
 0x5a8   : > { %v1361_v12 = vadd.f32 %v2604_v10, %v1268_v8 }
 0x5a9   : > { %v1351_v14 = vpop.f32.mrf.mxu0  ;;  %v1436_v17 = vpop.f32.mrf.mxu1 }
 0x5aa   : > { %v1360_v15 = vadd.f32 %v1351_v14, %v1267_v11  ;;  %v1446_v16 = vadd.f32 %v2611_v13, %v1361_v12 }
 0x5ac   : > { %v2618_v18 = vpop.f32.mrf.mxu0  ;;  %v1445_v26 = vadd.f32 %v1436_v17, %v1360_v15 }
 0x5ad   : > { %v1539_v48 = vadd.f32 %v2618_v18, %v1446_v16 }
 0x5ae   : > { %v1529_v47 = vpop.f32.mrf.mxu0 }
 0x5af   : > { %v1538_v49 = vadd.f32 %v1529_v47, %v1445_v26 }
 0x5b0   : > { %v2625_v27 = vpop.f32.mrf.mxu1 }
 0x5b1   : > { %v3271_v50 = vadd.f32 %v2625_v27, %v1539_v48 }
 0x5b2   : > { %v1622_v51 = vpop.f32.mrf.mxu1 }
 0x5b3   : > { %v3273_v52 = vadd.f32 %v1622_v51, %v1538_v49  ;;  %v1713_v53 = vmul.f32 %v3271_v50, %v3271_v50 }
 0x5b5   : > { %2658 = vmatprep.mubr.f32.mxu0 %v3273_v52  ;;  %v1712_v31 = vmul.f32 %v3273_v52, %v3273_v52 }
 0x5b6   : > { %2659 = vmatmul.mubr.f32.vlgmr.msra.gmra.mxu0 %v3271_v50 }
 0x5b7   : > { %2693 = vmatprep.mubr.f32.mxu1 %v1712_v31  ;;  %2700 = vmatprep.mubr.msk.f32.mxu0 %vm2780_vm7, %v2779_v36 }
 0x5b8   : > { %2694 = vmatmul.mubr.f32.vlgmr.msra.gmra.mxu1 %v1713_v53 }
 0x5b9   : > { %2707 = vmatprep.mubr.msk.f32.mxu1 %vm2780_vm7, %v2779_v36 }
 0x676   : > { %v2660_v54 = vpop.f32.mrf.mxu0 }
 0x677   : > { %2697 = vmatpush3.msra.mxu0 %v2660_v54 }
 0x678   : > { %v1703_v55 = vpop.f32.mrf.mxu0  ;;  %v2695_v33 = vpop.f32.mrf.mxu1  ;;  %2698 = vmatprep.subr.mxu0 %v2779_v36 }
 0x679   : > { %2699 = vmatpush3.msra.mxu0 %v1703_v55  ;;  %2704 = vmatpush3.msra.mxu1 %v2695_v33 }
 0x67a   : > { %v1780_v56 = vpop.f32.mrf.mxu1  ;;  %2701 = vmatmul.mubr.msk.f32.vlgmr.msra.gmra.mxu0 %vm786_vm8, %v3085_v38  ;;  %2705 = vmatprep.subr.mxu1 %v2779_v36  ;;  %v2148_v36 = vld [vmem:[%s3349_s9] sm:$0xff] }
 0x67b   : > { %2706 = vmatpush3.msra.mxu1 %v1780_v56  ;;  %2712 = vmatprep.mubr.msk.f32.mxu0 %vm937_vm9, %v3099_v42 }
 0x67c   : > { %2708 = vmatmul.mubr.msk.f32.vlgmr.msra.gmra.mxu1 %vm786_vm8, %v3085_v38  ;;  %v2149_v38 = vld [vmem:[%s3349_s9 + $0x8] sm:$0xff] }
 0x67d   : > { %2717 = vmatprep.mubr.msk.f32.mxu1 %vm937_vm9, %v3099_v42 }
 0x73a   : > { %v1855_v57 = vpop.f32.mrf.mxu0 }
 0x73b   : > { %v1929_v58 = vmul.f32 0.03125, %v1855_v57 }
 0x73c   : > { %v2702_v59 = vpop.f32.mrf.mxu0  ;;  %v1925_v60 = vpop.f32.mrf.mxu1 }
 0x73d   : > { %v1930_v61 = vmul.f32 0.03125, %v1925_v60  ;;  %v1931_v62 = vmul.f32 %v1929_v58, %v1929_v58  ;;  %2710 = vmatprep.subr.mxu0 %v1929_v58 }
 0x73e   : > { %v2709_v63 = vpop.f32.mrf.mxu1  ;;  %2711 = vmatpush3.msra.mxu0 %v1929_v58 }
 0x73f   : > { %v1932_v0 = vsub.f32 %v1930_v61, %v1931_v62  ;;  %2713 = vmatmul.mubr.msk.f32.vlgmr.msra.gmra.mxu0 %vm937_vm9, %v3108_v46  ;;  %2720 = vmatprep.subr.mxu0 %v2883_v1 }
 0x740   : > { %2721 = vmatpush3.msra.mxu0 %v2883_v1  ;;  %2722 = vmatprep.mubr.msk.f32.mxu0 %vm937_vm9, %v2148_v36  ;;  %v1634_v1 = vld [vmem:[%s3347_s7 + $0x8] sm:$0xff] }
 0x741   : > { %v1933_v42 = vmax.f32 %v1932_v0, 0.0 }
 0x743   : > { %v1934_v3 = vadd.f32 1e-05, %v1933_v42  ;;  %2723 = vmatmul.mubr.msk.f32.vlgmr.msra.gmra.mxu0 %vm937_vm9, %v2149_v38 }
 0x745   : > { %2756 = vrsqrt.f32 %v1934_v3 }
 0x752   : > { %v2757_v6 = vpop.eup %2756 }
 0x753   : > { %2715 = vmatprep.subr.mxu1 %v2757_v6 }
 0x754   : > { %2716 = vmatpush3.msra.mxu1 %v2757_v6 }
 0x755   : > { %2718 = vmatmul.mubr.msk.f32.vlgmr.msra.gmra.mxu1 %vm937_vm9, %v3108_v46  ;;  %v1635_v46 = vld [vmem:[%s3348_s8] sm:$0xff] }
 0x7ff   : > { %v2714_v19 = vpop.f32.mrf.mxu0 }
 0x801   : > { %v2002_v35 = vpop.f32.mrf.mxu0 }
 0x815   : > { %v2719_v7 = vpop.f32.mrf.mxu1 }
 0x816   : > { %v2087_v28 = vmul.f32 %v2719_v7, %v1634_v1 }
 0x817   : > { %v2077_v30 = vpop.f32.mrf.mxu1 }
 0x818   : > { %v2089_v32 = vmul.f32 %v2714_v19, %v2087_v28  ;;  %v2086_v34 = vmul.f32 %v2077_v30, %v1633_v25  ;;  %2099 = vperm.xlu0 %2744, %v2087_v28  }
 0x81a   : > { %v2091_v37 = vsub.f32 %v1636_v29, %v2089_v32  ;;  %v2088_v39 = vmul.f32 %v2086_v34, %v2002_v35  ;;  %2094 = vperm.xlu1 %2745, %v2086_v34  }
 0x81c   : > { %v2090_v20 = vsub.f32 %v1635_v46, %v2088_v39  ;;  %2111 = vperm.xlu0 %2744, %v2091_v37  }
 0x81e   : > { %2106 = vperm.xlu1 %2745, %v2090_v20  }
 0x820   : > { %2159 = vperm.xlu0 %2744, %v2151_v40  }
 0x822   : > { %2154 = vperm.xlu1 %2745, %v2150_v41  }
 0x893   : > { %v2100_v24 = vpop.permute.xlu0 %2099 }
 0x894   : > { %v2103_v21 = vmul.f32 %v3147_v23, %v2100_v24 }
 0x895   : > { %v2095_v43 = vpop.permute.xlu1 %2094 }
 0x896   : > { %v2102_v22 = vmul.f32 %v3147_v23, %v2095_v43  ;;  %v2117_v45 = vmul.f32 %v2103_v21, %v3271_v50 }
 0x897   : > { %v2112_v44 = vpop.permute.xlu0 %2111 }
 0x898   : > { %v2115_v2 = vmul.f32 %v3147_v23, %v2112_v44  ;;  %v2116_v5 = vmul.f32 %v2102_v22, %v3273_v52  ;;  %v2724_v52 = vpop.f32.mrf.mxu0 }
 0x899   : > { %v2107_v4 = vpop.permute.xlu1 %2106 }
 0x89a   : > { %v2119_v8 = vadd.f32 %v2117_v45, %v2115_v2  ;;  %v2114_v9 = vmul.f32 %v3147_v23, %v2107_v4  ;;  %v2234_v57 = vpop.f32.mrf.mxu0 }
 0x89b   : > { %v2160_v53 = vpop.permute.xlu0 %2159 }
 0x89c   : > { %v2121_v10 = vmin.f32 %v2119_v8, 20.0  ;;  %v2118_v11 = vadd.f32 %v2116_v5, %v2114_v9  ;;  %vm2141_vm12 = vcmp.gt.f32.partialorder %v2119_v8, 20.0  ;;  %v2240_v61 = vadd.f32 %v2724_v52, %v2160_v53 }
 0x89d   : > { %v2155_v60 = vpop.permute.xlu1 %2154 }
 0x89e   : > { %v2124_v12 = vmul.f32 1.442695, %v2121_v10  ;;  %v2120_v13 = vmin.f32 %v2118_v11, 20.0  ;;  %vm2140_vm13 = vcmp.gt.f32.partialorder %v2118_v11, 20.0  ;;  %v2235_v0 = vadd.f32 %v2234_v57, %v2155_v60 }
 0x8a0   : > { %2758 = vpow2.f32 %v2124_v12  ;;  %v2122_v14 = vmul.f32 1.442695, %v2120_v13 }
 0x8a2   : > { %2760 = vpow2.f32 %v2122_v14 }
 0x8ad   : > { %v2759_v15 = vpop.eup %2758 }
 0x8ae   : > { %v2127_v16 = vadd.f32 2.0, %v2759_v15 }
 0x8af   : > { %v2761_v17 = vpop.eup %2760 }
 0x8b0   : > { %v2129_v18 = vmul.f32 %v2759_v15, %v2127_v16  ;;  %v2126_v26 = vadd.f32 2.0, %v2761_v17 }
 0x8b2   : > { %v2131_v47 = vadd.f32 2.0, %v2129_v18  ;;  %v2128_v48 = vmul.f32 %v2761_v17, %v2126_v26  ;;  %v2143_v55 = vmul.f32 %v2129_v18, %v2119_v8 }
 0x8b4   : > { %2762 = vrcp.f32 %v2131_v47  ;;  %v2130_v27 = vadd.f32 2.0, %v2128_v48  ;;  %v2142_v59 = vmul.f32 %v2128_v48, %v2118_v11 }
 0x8b6   : > { %2764 = vrcp.f32 %v2130_v27 }
 0x8c1   : > { %v2763_v49 = vpop.eup %2762 }
 0x8c2   : > { %v2135_v23 = vmul.f32 %v2763_v49, %v2131_v47 }
 0x8c3   : > { %v2765_v50 = vpop.eup %2764 }
 0x8c4   : > { %v2137_v51 = vsub.f32 2.0, %v2135_v23  ;;  %v2134_v31 = vmul.f32 %v2765_v50, %v2130_v27 }
 0x8c6   : > { %v2139_v54 = vmul.f32 %v2763_v49, %v2137_v51  ;;  %v2136_v33 = vsub.f32 2.0, %v2134_v31 }
 0x8c8   : > { %v2145_v56 = vmul.f32 %v2143_v55, %v2139_v54  ;;  %v2138_v58 = vmul.f32 %v2765_v50, %v2136_v33 }
 0x8ca   : > { %v2147_v62 = vsel %vm2141_vm12, %v2119_v8, %v2145_v56  ;;  %v2144_v36 = vmul.f32 %v2142_v59, %v2138_v58 }
 0x8cb   : > { %v2244_v63 = vadd.f32 %v2240_v61, %v2147_v62 }
 0x8cc   : > { %v2146_v38 = vsel %vm2140_vm13, %v2118_v11, %v2144_v36 }
 0x8cd   : > { %2246 = vst [vmem:[%s491_s22 + $0x8] sm:$0xff] %v2244_v63  ;;  %v2243_v42 = vadd.f32 %v2235_v0, %v2146_v38 }
 0x8cf   : > { %2245 = vst [vmem:[%s491_s22] sm:$0xff] %v2243_v42 }
 0x8d0 PF: > { %s25_s18 = sadd.s32 1, %s2772_s18  }
 0x8d1   : > { %p22_p4 = scmp.ge.s32.totalorder %s25_s18, 4  }
 0x8d3   :  { %24 = sbr.rel (!%p22_p4) target bundleno = 1 (0x1), region = 110 }

</bundles_post_ra>
